<compile_context>
chip_gen: v7x
topology: tpu7x:2x2x1
jax: 0.10.0
libtpu: 0.0.40
codegen_flags: <defaults>
</compile_context>

<pallas_src>
import functools

import jax
import jax.numpy as jnp
from jax import lax
from jax.experimental import pallas as pl
from jax.experimental.pallas import tpu as pltpu

_NEG_INF = -1e30
_MIB = 1024 * 1024


# --------------------------------------------------------------------------
# Chip-adaptive budgets
# --------------------------------------------------------------------------
@functools.lru_cache(maxsize=None)
def _vmem_capacity_bytes():
    try:
        return int(pltpu.get_tpu_info().vmem_capacity_bytes)
    except Exception:
        return 0  # unknown -> conservative defaults below


def _vmem_limit_bytes():
    cap = _vmem_capacity_bytes()
    if cap <= 0:
        return 48 * _MIB
    # leave ~24 MiB headroom for compiler-internal scratch; cap the request.
    return max(32 * _MIB, min(cap - 24 * _MIB, 100 * _MIB))


def _row_budget():
    # rows (t_tile * B) folded into one encoder-layer grid block
    return 1024 if _vmem_capacity_bytes() >= 100 * _MIB else 512


def _vocab_tile_budget():
    return 2048 if _vmem_capacity_bytes() >= 100 * _MIB else 1024


# --------------------------------------------------------------------------
# Shared math helpers (pure jnp, usable inside kernels and in the reference)
# --------------------------------------------------------------------------
def _layer_norm(x, g, b, eps=1e-5):
    mu = jnp.mean(x, axis=-1, keepdims=True)
    var = jnp.mean(jnp.square(x - mu), axis=-1, keepdims=True)
    return (x - mu) * lax.rsqrt(var + eps) * g + b


# --------------------------------------------------------------------------
# Row-block planning
# --------------------------------------------------------------------------
def _plan_row_block(t, b, max_rows, redundancy_cap=8):
    """Pick (t_tile, grouped): how many attention groups go into one grid
    block, and whether the exact per-group (grouped) attention path is used.

    grouped=True  -> scores computed per group, (G, B, B); needs B % 8 == 0.
    grouped=False -> block-diagonal-mask path; redundancy (=t_tile) is capped.
    """
    divisors = [d for d in range(1, t + 1) if t % d == 0]
    if b % 8 == 0:
        cands = [d for d in divisors if d * b <= max_rows] or [1]
        multi = [d for d in cands if t // d >= 2]        # feed both TCs
        return max(multi or cands), True
    cands = [d for d in divisors if (d * b) % 8 == 0 and d * b <= max_rows]
    if not cands:
        # No 8-aligned divisor fits the budget: one full-array block (always a
        # legal BlockSpec; cost is linear in T*B since redundancy is bounded
        # by the masked-score width, not quadratic VMEM anymore).
        return t, False
    capped = [d for d in cands if d <= redundancy_cap] or [min(cands)]
    multi = [d for d in capped if t // d >= 2]
    return max(multi or capped), False


def _largest_tile(dim, limit, align):
    """Largest divisor of `dim` that is <= limit and a multiple of `align`."""
    if dim <= limit:
        return dim
    best = 0
    for d in range(align, limit + 1, align):
        if dim % d == 0:
            best = d
    return best if best > 0 else dim  # full dim is always legal


def _build_attn_bias(groups, grp):
    """Block-diagonal additive mask (built once in XLA, tiny after capping)."""
    gid = jnp.repeat(jnp.arange(groups, dtype=jnp.int32), grp)
    eq = gid[:, None] == gid[None, :]
    return jnp.where(eq, 0.0, _NEG_INF).astype(jnp.float32)


# --------------------------------------------------------------------------
# Pallas kernel: one fused nn.TransformerEncoderLayer (post-LN, ReLU FFN)
#   processes R = t_tile * B rows (t_tile complete attention groups) per step.
# --------------------------------------------------------------------------
def encoder_layer_kernel(x_ref, bias_ref,
                         wqkv_ref, bqkv_ref, wo_ref, bo_ref,
                         w1_ref, b1_ref, w2_ref, b2_ref,
                         g1_ref, be1_ref, g2_ref, be2_ref,
                         gf_ref, bf_ref,
                         o_ref, attn_sc,
                         *, n_head, groups, grp, grouped, use_mask,
                         fuse_final_ln):
    x = x_ref[...]                                   # (R, E), R = groups*grp
    r, e = x.shape
    dh = e // n_head
    scale = 1.0 / (dh ** 0.5)

    # Fused Q/K/V projection on the whole row block: (R, E) @ (E, 3E).
    qkv = jnp.dot(x, wqkv_ref[...],
                  preferred_element_type=jnp.float32) + bqkv_ref[...]

    bias = bias_ref[...] if use_mask else None       # (R, R) block-diag mask

    for h in range(n_head):
        q = qkv[:, h * dh:(h + 1) * dh]
        k = qkv[:, e + h * dh:e + (h + 1) * dh]
        v = qkv[:, 2 * e + h * dh:2 * e + (h + 1) * dh]
        if grouped:
            # Exact per-group attention, batched over the `groups` axis:
            # (G, B, B) scores -- no mask, no redundant work.
            qg = q.reshape(groups, grp, dh)
            kg = k.reshape(groups, grp, dh)
            vg = v.reshape(groups, grp, dh)
            s = jnp.einsum('gqd,gkd->gqk', qg, kg,
                           preferred_element_type=jnp.float32) * scale
            p = jnp.exp(s - jnp.max(s, axis=-1, keepdims=True))
            inv = pl.reciprocal(jnp.sum(p, axis=-1, keepdims=True),
                                approx=True)
            og = jnp.einsum('gqk,gkd->gqd', p, vg,
                            preferred_element_type=jnp.float32) * inv
            attn_sc[:, h * dh:(h + 1) * dh] = og.reshape(r, dh)
        else:
            # Capped block-diagonal-mask path (small R/B ratio).
            s = lax.dot_general(q, k, (((1,), (1,)), ((), ())),
                                preferred_element_type=jnp.float32) * scale
            if use_mask:
                s = s + bias
            p = jnp.exp(s - jnp.max(s, axis=-1, keepdims=True))
            inv = pl.reciprocal(jnp.sum(p, axis=-1, keepdims=True),
                                approx=True)
            attn_sc[:, h * dh:(h + 1) * dh] = (
                jnp.dot(p, v, preferred_element_type=jnp.float32) * inv)

    attn = jnp.dot(attn_sc[...], wo_ref[...],
                   preferred_element_type=jnp.float32) + bo_ref[...]

    # post-LN residual block 1
    x1 = _layer_norm(x + attn, g1_ref[...], be1_ref[...])

    # feed-forward: ReLU(x1 @ W1 + b1) @ W2 + b2
    ff = jnp.dot(x1, w1_ref[...],
                 preferred_element_type=jnp.float32) + b1_ref[...]
    ff = jnp.maximum(ff, 0.0)
    ff = jnp.dot(ff, w2_ref[...],
                 preferred_element_type=jnp.float32) + b2_ref[...]

    # post-LN residual block 2 (+ fused final ln_f for the last layer)
    y = _layer_norm(x1 + ff, g2_ref[...], be2_ref[...])
    if fuse_final_ln:
        y = _layer_norm(y, gf_ref[...], bf_ref[...])
    o_ref[...] = y


def encoder_layer_pallas(x_rows, attn_bias, lp, lnf_g, lnf_b, *,
                         n_head, t_tile, grp, grouped, fuse_final_ln):
    """x_rows: (T*B, E) rows ordered t-major, b-minor."""
    rt, e = x_rows.shape
    r = t_tile * grp                       # rows per grid block
    fh = lp["lin1_w"].shape[1]             # feed-forward hidden (4E)
    grid = (rt // r,)
    use_mask = (not grouped) and (t_tile > 1)

    def const(shape):
        return pl.BlockSpec(shape, lambda i: (0,) * len(shape))

    kernel = functools.partial(
        encoder_layer_kernel, n_head=n_head, groups=t_tile, grp=grp,
        grouped=grouped, use_mask=use_mask, fuse_final_ln=fuse_final_ln)

    return pl.pallas_call(
        kernel,
        out_shape=jax.ShapeDtypeStruct((rt, e), jnp.float32),
        grid=grid,
        in_specs=[
            pl.BlockSpec((r, e), lambda i: (i, 0)),   # activation rows
            const(attn_bias.shape),                   # mask (or (1,1) dummy)
            const((e, 3 * e)), const((1, 3 * e)),     # in_proj  (pre-transposed)
            const((e, e)), const((1, e)),             # out_proj (pre-transposed)
            const((e, fh)), const((1, fh)),           # linear1  (pre-transposed)
            const((fh, e)), const((1, e)),            # linear2  (pre-transposed)
            const((1, e)), const((1, e)),             # norm1 (g, b)
            const((1, e)), const((1, e)),             # norm2 (g, b)
            const((1, e)), const((1, e)),             # ln_f  (used on last layer)
        ],
        out_specs=pl.BlockSpec((r, e), lambda i: (i, 0)),
        scratch_shapes=[pltpu.VMEM((r, e), jnp.float32)],
        compiler_params=pltpu.CompilerParams(
            dimension_semantics=("parallel",),
            vmem_limit_bytes=_vmem_limit_bytes()),
    )(x_rows, attn_bias,
      lp["in_proj_w"], lp["in_proj_b"],
      lp["out_proj_w"], lp["out_proj_b"],
      lp["lin1_w"], lp["lin1_b"],
      lp["lin2_w"], lp["lin2_b"],
      lp["norm1_g"], lp["norm1_b"],
      lp["norm2_g"], lp["norm2_b"],
      lnf_g, lnf_b)


# --------------------------------------------------------------------------
# Pallas kernel: vocab head (ln_f already fused into the last encoder layer).
# Vocab axis is the OUTER grid dim so head_w is streamed from HBM once.
# --------------------------------------------------------------------------
def head_kernel(x_ref, wh_ref, bh_ref, o_ref):
    o_ref[...] = (jnp.dot(x_ref[...], wh_ref[...],
                          preferred_element_type=jnp.float32) + bh_ref[...])


def head_pallas(x_rows, head_w, head_b):
    rt, e = x_rows.shape
    v = head_w.shape[1]
    tm = _largest_tile(rt, 512, 8)
    tn = _largest_tile(v, _vocab_tile_budget(), 128)
    grid = (v // tn, rt // tm)
    return pl.pallas_call(
        head_kernel,
        out_shape=jax.ShapeDtypeStruct((rt, v), jnp.float32),
        grid=grid,
        in_specs=[
            pl.BlockSpec((tm, e), lambda j, i: (i, 0)),
            pl.BlockSpec((e, tn), lambda j, i: (0, j)),
            pl.BlockSpec((1, tn), lambda j, i: (0, j)),
        ],
        out_specs=pl.BlockSpec((tm, tn), lambda j, i: (i, j)),
        compiler_params=pltpu.CompilerParams(
            dimension_semantics=("parallel", "parallel"),
            vmem_limit_bytes=_vmem_limit_bytes()),
    )(x_rows, head_w, head_b)


# --------------------------------------------------------------------------
# Full forward pass (embedding gather / layout transpose is glue)
# --------------------------------------------------------------------------
def transformer_forward(idx, params, n_head):
    b, t = idx.shape
    e = params["tok_emb"].shape[1]
    x = jnp.take(params["tok_emb"], idx, axis=0) \
        + params["pos_emb"][:t][None, :, :]                       # (B, T, E)

    # batch_first=False semantics: attention over B, batched over T.
    # Flatten to (T*B, E) rows so every kernel block holds whole B-row groups.
    x_rows = jnp.transpose(x, (1, 0, 2)).reshape(t * b, e)

    t_tile, grouped = _plan_row_block(t, b, _row_budget())
    use_mask = (not grouped) and (t_tile > 1)
    attn_bias = (_build_attn_bias(t_tile, b) if use_mask
                 else jnp.zeros((1, 1), jnp.float32))

    n_layer = len(params["layers"])
    for li, lp in enumerate(params["layers"]):
        x_rows = encoder_layer_pallas(
            x_rows, attn_bias, lp, params["lnf_g"], params["lnf_b"],
            n_head=n_head, t_tile=t_tile, grp=b, grouped=grouped,
            fuse_final_ln=(li == n_layer - 1))

    # Back to B-major rows for the vocab head / final output layout.
    x_rows = jnp.transpose(x_rows.reshape(t, b, e), (1, 0, 2)).reshape(b * t, e)
    logits = head_pallas(x_rows, params["head_w"], params["head_b"])
    return logits.reshape(b, t, -1)


# --------------------------------------------------------------------------
# Pure-JAX reference (same semantics) for a sanity check
# --------------------------------------------------------------------------
def reference_forward(idx, params, n_head):
    b, t = idx.shape
    x = params["tok_emb"][idx] + params["pos_emb"][:t][None]      # (B, T, E)
    for lp in params["layers"]:
        e = x.shape[-1]
        dh = e // n_head
        qkv = x @ lp["in_proj_w"] + lp["in_proj_b"]
        q, k, v = qkv[..., :e], qkv[..., e:2 * e], qkv[..., 2 * e:]
        q = q.reshape(b, t, n_head, dh)
        k = k.reshape(b, t, n_head, dh)
        v = v.reshape(b, t, n_head, dh)
        # attention over axis 0 (torch seq = B), batch axis = T
        s = jnp.einsum("sthd,uthd->thsu", q, k) / (dh ** 0.5)
        s = s - jnp.max(s, axis=-1, keepdims=True)
        p = jnp.exp(s)
        p = p / jnp.sum(p, axis=-1, keepdims=True)
        o = jnp.einsum("thsu,uthd->sthd", p, v).reshape(b, t, e)
        attn = o @ lp["out_proj_w"] + lp["out_proj_b"]
        x1 = _layer_norm(x + attn, lp["norm1_g"], lp["norm1_b"])
        ff = jnp.maximum(x1 @ lp["lin1_w"] + lp["lin1_b"], 0.0)
        ff = ff @ lp["lin2_w"] + lp["lin2_b"]
        x = _layer_norm(x1 + ff, lp["norm2_g"], lp["norm2_b"])
    xn = _layer_norm(x, params["lnf_g"], params["lnf_b"])
    return xn @ params["head_w"] + params["head_b"]


# --------------------------------------------------------------------------
# Deterministic parameter init.  Weights are stored PRE-TRANSPOSED as
# (in_features, out_features); biases / LN params as (1, D) rows.
# --------------------------------------------------------------------------
def init_params(key, vocab, n_embd, n_head, n_layer, block_size):
    del n_head
    keys = jax.random.split(key, 4 + n_layer)

    def w(k, shape, scale=0.02):
        return (scale * jax.random.normal(k, shape)).astype(jnp.float32)

    params = {
        "tok_emb": w(keys[0], (vocab, n_embd)),
        "pos_emb": w(keys[1], (block_size, n_embd)),
        "lnf_g": jnp.ones((1, n_embd), jnp.float32),
        "lnf_b": jnp.zeros((1, n_embd), jnp.float32),
        "head_w": w(keys[2], (n_embd, vocab)),      # (E, V) pre-transposed
        "head_b": w(keys[3], (1, vocab)),
        "layers": [],
    }
    ff = 4 * n_embd
    for layer_idx in range(n_layer):
        lk = jax.random.split(keys[4 + layer_idx], 10)
        params["layers"].append({
            "in_proj_w": w(lk[0], (n_embd, 3 * n_embd)),
            "in_proj_b": w(lk[1], (1, 3 * n_embd)),
            "out_proj_w": w(lk[2], (n_embd, n_embd)),
            "out_proj_b": w(lk[3], (1, n_embd)),
            "lin1_w": w(lk[4], (n_embd, ff)),
            "lin1_b": w(lk[5], (1, ff)),
            "lin2_w": w(lk[6], (ff, n_embd)),
            "lin2_b": w(lk[7], (1, n_embd)),
            "norm1_g": 1.0 + w(lk[8], (1, n_embd)),
            "norm1_b": jnp.zeros((1, n_embd), jnp.float32),
            "norm2_g": 1.0 + w(lk[9], (1, n_embd)),
            "norm2_b": jnp.zeros((1, n_embd), jnp.float32),
        })
    return params


if __name__ == "__main__":
    VOCAB, N_EMBD, N_HEAD, N_LAYER, BLOCK_SIZE = 64, 32, 4, 2, 16
    B, T = 2, 8

    key = jax.random.PRNGKey(0)
    pkey, ikey = jax.random.split(key)
    params = init_params(pkey, VOCAB, N_EMBD, N_HEAD, N_LAYER, BLOCK_SIZE)
    idx = jax.random.randint(ikey, (B, T), 0, VOCAB, dtype=jnp.int32)

    fwd = jax.jit(transformer_forward, static_argnums=2)
    logits = jax.block_until_ready(fwd(idx, params, N_HEAD))

    ref = reference_forward(idx, params, N_HEAD)
    assert logits.shape == (B, T, VOCAB)
    assert bool(jnp.all(jnp.isfinite(logits)))
    err = float(jnp.max(jnp.abs(logits - ref)))
    assert err < 2e-2, f"max abs err {err}"

    print("KERNEL_OK")
</pallas_src>

<mosaic_0001>
module attributes {stable_mosaic.version = 11 : i64} {
  func.func @head_kernel(%arg0: i32, %arg1: i32, %arg2: memref<16x32xf32, #tpu.memory_space<vmem>>, %arg3: memref<32x64xf32, #tpu.memory_space<vmem>>, %arg4: memref<1x64xf32, #tpu.memory_space<vmem>>, %arg5: memref<16x64xf32, #tpu.memory_space<vmem>>) attributes {dimension_semantics = [#tpu.dimension_semantics<parallel>, #tpu.dimension_semantics<parallel>], iteration_bounds = array<i64: 1, 1>, scalar_prefetch = 0 : i64, scratch_operands = 0 : i64, tpu.core_type = #tpu.core_type<tc>, window_params = [{transform_indices = @transform_0, window_bounds = array<i64: 16, 32>}, {transform_indices = @transform_1, window_bounds = array<i64: 32, 64>}, {transform_indices = @transform_2, window_bounds = array<i64: 1, 64>}, {transform_indices = @transform_3, window_bounds = array<i64: 16, 64>}]} {
    %c0 = arith.constant 0 : index
    %c0_0 = arith.constant 0 : index
    %0 = vector.load %arg2[%c0, %c0_0] : memref<16x32xf32, #tpu.memory_space<vmem>>, vector<16x32xf32>
    %c0_1 = arith.constant 0 : index
    %c0_2 = arith.constant 0 : index
    %1 = vector.load %arg3[%c0_1, %c0_2] : memref<32x64xf32, #tpu.memory_space<vmem>>, vector<32x64xf32>
    %cst = arith.constant dense<0.000000e+00> : vector<16x64xf32>
    %2 = tpu.matmul %0, %1, %cst {dimension_numbers = #tpu.dot_dimension_numbers<[1], [0], [0], [1], [0, 0, 1, 1], [], []>} : vector<16x32xf32>, vector<32x64xf32>, vector<16x64xf32> -> vector<16x64xf32>
    %c0_3 = arith.constant 0 : index
    %c0_4 = arith.constant 0 : index
    %3 = vector.load %arg4[%c0_3, %c0_4] : memref<1x64xf32, #tpu.memory_space<vmem>>, vector<1x64xf32>
    %4 = vector.broadcast %3 : vector<1x64xf32> to vector<16x64xf32>
    %5 = arith.addf %2, %4 : vector<16x64xf32>
    %c0_5 = arith.constant 0 : index
    %c0_6 = arith.constant 0 : index
    %6 = vector.load %arg5[%c0_5, %c0_6] : memref<16x64xf32, #tpu.memory_space<vmem>>, vector<16x64xf32>
    tpu.vector_store %arg5[%c0_5, %c0_6], %5 {strides = array<i32>} : memref<16x64xf32, #tpu.memory_space<vmem>>, vector<16x64xf32>,
    return
  }
  func.func @transform_0(%arg0: i32, %arg1: i32) -> (i32, i32) {
    %c0_i32 = arith.constant 0 : i32
    %c0_i32_0 = arith.constant 0 : i32
    return %arg1, %c0_i32 : i32, i32
  }
  func.func @transform_1(%arg0: i32, %arg1: i32) -> (i32, i32) {
    %c0_i32 = arith.constant 0 : i32
    %c0_i32_0 = arith.constant 0 : i32
    return %c0_i32, %arg0 : i32, i32
  }
  func.func @transform_2(%arg0: i32, %arg1: i32) -> (i32, i32) {
    %c0_i32 = arith.constant 0 : i32
    %c0_i32_0 = arith.constant 0 : i32
    return %c0_i32, %arg0 : i32, i32
  }
  func.func @transform_3(%arg0: i32, %arg1: i32) -> (i32, i32) {
    %c0_i32 = arith.constant 0 : i32
    return %arg1, %arg0 : i32, i32
  }
}

module attributes {stable_mosaic.version = 11 : i64} {
  func.func @encoder_layer_kernel(%arg0: i32, %arg1: memref<8x32xf32, #tpu.memory_space<vmem>>, %arg2: memref<8x8xf32, #tpu.memory_space<vmem>>, %arg3: memref<32x96xf32, #tpu.memory_space<vmem>>, %arg4: memref<1x96xf32, #tpu.memory_space<vmem>>, %arg5: memref<32x32xf32, #tpu.memory_space<vmem>>, %arg6: memref<1x32xf32, #tpu.memory_space<vmem>>, %arg7: memref<32x128xf32, #tpu.memory_space<vmem>>, %arg8: memref<1x128xf32, #tpu.memory_space<vmem>>, %arg9: memref<128x32xf32, #tpu.memory_space<vmem>>, %arg10: memref<1x32xf32, #tpu.memory_space<vmem>>, %arg11: memref<1x32xf32, #tpu.memory_space<vmem>>, %arg12: memref<1x32xf32, #tpu.memory_space<vmem>>, %arg13: memref<1x32xf32, #tpu.memory_space<vmem>>, %arg14: memref<1x32xf32, #tpu.memory_space<vmem>>, %arg15: memref<1x32xf32, #tpu.memory_space<vmem>>, %arg16: memref<1x32xf32, #tpu.memory_space<vmem>>, %arg17: memref<8x32xf32, #tpu.memory_space<vmem>>, %arg18: memref<8x32xf32, #tpu.memory_space<vmem>>) attributes {dimension_semantics = [#tpu.dimension_semantics<parallel>], iteration_bounds = array<i64: 2>, scalar_prefetch = 0 : i64, scratch_operands = 1 : i64, tpu.core_type = #tpu.core_type<tc>, window_params = [{transform_indices = @transform_0, window_bounds = array<i64: 8, 32>}, {pipeline_mode = #tpu.pipeline_mode<synchronous>, transform_indices = @transform_1, window_bounds = array<i64: 8, 8>}, {pipeline_mode = #tpu.pipeline_mode<synchronous>, transform_indices = @transform_2, window_bounds = array<i64: 32, 96>}, {pipeline_mode = #tpu.pipeline_mode<synchronous>, transform_indices = @transform_3, window_bounds = array<i64: 1, 96>}, {pipeline_mode = #tpu.pipeline_mode<synchronous>, transform_indices = @transform_4, window_bounds = array<i64: 32, 32>}, {pipeline_mode = #tpu.pipeline_mode<synchronous>, transform_indices = @transform_5, window_bounds = array<i64: 1, 32>}, {pipeline_mode = #tpu.pipeline_mode<synchronous>, transform_indices = @transform_6, window_bounds = array<i64: 32, 128>}, {pipeline_mode = #tpu.pipeline_mode<synchronous>, transform_indices = @transform_7, window_bounds = array<i64: 1, 128>}, {pipeline_mode = #tpu.pipeline_mode<synchronous>, transform_indices = @transform_8, window_bounds = array<i64: 128, 32>}, {pipeline_mode = #tpu.pipeline_mode<synchronous>, transform_indices = @transform_9, window_bounds = array<i64: 1, 32>}, {pipeline_mode = #tpu.pipeline_mode<synchronous>, transform_indices = @transform_10, window_bounds = array<i64: 1, 32>}, {pipeline_mode = #tpu.pipeline_mode<synchronous>, transform_indices = @transform_11, window_bounds = array<i64: 1, 32>}, {pipeline_mode = #tpu.pipeline_mode<synchronous>, transform_indices = @transform_12, window_bounds = array<i64: 1, 32>}, {pipeline_mode = #tpu.pipeline_mode<synchronous>, transform_indices = @transform_13, window_bounds = array<i64: 1, 32>}, {pipeline_mode = #tpu.pipeline_mode<synchronous>, transform_indices = @transform_14, window_bounds = array<i64: 1, 32>}, {pipeline_mode = #tpu.pipeline_mode<synchronous>, transform_indices = @transform_15, window_bounds = array<i64: 1, 32>}, {transform_indices = @transform_16, window_bounds = array<i64: 8, 32>}]} {
    %c0 = arith.constant 0 : index
    %c0_0 = arith.constant 0 : index
    %0 = vector.load %arg1[%c0, %c0_0] : memref<8x32xf32, #tpu.memory_space<vmem>>, vector<8x32xf32>
    %c0_1 = arith.constant 0 : index
    %c0_2 = arith.constant 0 : index
    %1 = vector.load %arg3[%c0_1, %c0_2] : memref<32x96xf32, #tpu.memory_space<vmem>>, vector<32x96xf32>
    %cst = arith.constant dense<0.000000e+00> : vector<8x96xf32>
    %2 = tpu.matmul %0, %1, %cst {dimension_numbers = #tpu.dot_dimension_numbers<[1], [0], [0], [1], [0, 0, 1, 1], [], []>} : vector<8x32xf32>, vector<32x96xf32>, vector<8x96xf32> -> vector<8x96xf32>
    %c0_3 = arith.constant 0 : index
    %c0_4 = arith.constant 0 : index
    %3 = vector.load %arg4[%c0_3, %c0_4] : memref<1x96xf32, #tpu.memory_space<vmem>>, vector<1x96xf32>
    %4 = vector.broadcast %3 : vector<1x96xf32> to vector<8x96xf32>
    %5 = arith.addf %2, %4 : vector<8x96xf32>
    %c0_5 = arith.constant 0 : index
    %c0_6 = arith.constant 0 : index
    %6 = vector.load %arg2[%c0_5, %c0_6] : memref<8x8xf32, #tpu.memory_space<vmem>>, vector<8x8xf32>
    %7 = vector.extract_strided_slice %5 {offsets = [0, 0], sizes = [8, 8], strides = [1, 1]} : vector<8x96xf32> to vector<8x8xf32>
    %8 = vector.extract_strided_slice %5 {offsets = [0, 32], sizes = [8, 8], strides = [1, 1]} : vector<8x96xf32> to vector<8x8xf32>
    %9 = vector.extract_strided_slice %5 {offsets = [0, 64], sizes = [8, 8], strides = [1, 1]} : vector<8x96xf32> to vector<8x8xf32>
    %cst_7 = arith.constant dense<0.000000e+00> : vector<8x8xf32>
    %10 = tpu.matmul %7, %8, %cst_7 {dimension_numbers = #tpu.dot_dimension_numbers<[1], [1], [0], [0], [0, 0, 1, 0], [], []>} : vector<8x8xf32>, vector<8x8xf32>, vector<8x8xf32> -> vector<8x8xf32>
    %cst_8 = arith.constant 0.353553385 : f32
    %11 = vector.broadcast %cst_8 : f32 to vector<8x8xf32>
    %12 = arith.mulf %10, %11 : vector<8x8xf32>
    %13 = arith.addf %12, %6 : vector<8x8xf32>
    %cst_9 = arith.constant dense<0xFF800000> : vector<8xf32>
    %14 = vector.multi_reduction <maximumf>, %13, %cst_9 [1] : vector<8x8xf32> to vector<8xf32>
    %15 = vector.shape_cast %14 : vector<8xf32> to vector<8x1xf32>
    %16 = vector.broadcast %15 : vector<8x1xf32> to vector<8x8xf32>
    %17 = arith.subf %13, %16 : vector<8x8xf32>
    %18 = math.exp %17 : vector<8x8xf32>
    %cst_10 = arith.constant dense<0.000000e+00> : vector<8xf32>
    %19 = vector.multi_reduction <add>, %18, %cst_10 [1] : vector<8x8xf32> to vector<8xf32>
    %20 = vector.shape_cast %19 : vector<8xf32> to vector<8x1xf32>
    %21 = tpu.reciprocal %20 {approx = true} : vector<8x1xf32> -> vector<8x1xf32>
    %cst_11 = arith.constant dense<0.000000e+00> : vector<8x8xf32>
    %22 = tpu.matmul %18, %9, %cst_11 {dimension_numbers = #tpu.dot_dimension_numbers<[1], [0], [0], [1], [0, 0, 1, 1], [], []>} : vector<8x8xf32>, vector<8x8xf32>, vector<8x8xf32> -> vector<8x8xf32>
    %23 = vector.broadcast %21 : vector<8x1xf32> to vector<8x8xf32>
    %24 = arith.mulf %22, %23 : vector<8x8xf32>
    %c0_12 = arith.constant 0 : index
    %c0_13 = arith.constant 0 : index
    %25 = vector.load %arg18[%c0_12, %c0_13] : memref<8x32xf32, #tpu.memory_space<vmem>>, vector<8x8xf32>
    tpu.vector_store %arg18[%c0_12, %c0_13], %24 {strides = array<i32>} : memref<8x32xf32, #tpu.memory_space<vmem>>, vector<8x8xf32>,
    %26 = vector.extract_strided_slice %5 {offsets = [0, 8], sizes = [8, 8], strides = [1, 1]} : vector<8x96xf32> to vector<8x8xf32>
    %27 = vector.extract_strided_slice %5 {offsets = [0, 40], sizes = [8, 8], strides = [1, 1]} : vector<8x96xf32> to vector<8x8xf32>
    %28 = vector.extract_strided_slice %5 {offsets = [0, 72], sizes = [8, 8], strides = [1, 1]} : vector<8x96xf32> to vector<8x8xf32>
    %cst_14 = arith.constant dense<0.000000e+00> : vector<8x8xf32>
    %29 = tpu.matmul %26, %27, %cst_14 {dimension_numbers = #tpu.dot_dimension_numbers<[1], [1], [0], [0], [0, 0, 1, 0], [], []>} : vector<8x8xf32>, vector<8x8xf32>, vector<8x8xf32> -> vector<8x8xf32>
    %cst_15 = arith.constant 0.353553385 : f32
    %30 = vector.broadcast %cst_15 : f32 to vector<8x8xf32>
    %31 = arith.mulf %29, %30 : vector<8x8xf32>
    %32 = arith.addf %31, %6 : vector<8x8xf32>
    %cst_16 = arith.constant dense<0xFF800000> : vector<8xf32>
    %33 = vector.multi_reduction <maximumf>, %32, %cst_16 [1] : vector<8x8xf32> to vector<8xf32>
    %34 = vector.shape_cast %33 : vector<8xf32> to vector<8x1xf32>
    %35 = vector.broadcast %34 : vector<8x1xf32> to vector<8x8xf32>
    %36 = arith.subf %32, %35 : vector<8x8xf32>
    %37 = math.exp %36 : vector<8x8xf32>
    %cst_17 = arith.constant dense<0.000000e+00> : vector<8xf32>
    %38 = vector.multi_reduction <add>, %37, %cst_17 [1] : vector<8x8xf32> to vector<8xf32>
    %39 = vector.shape_cast %38 : vector<8xf32> to vector<8x1xf32>
    %40 = tpu.reciprocal %39 {approx = true} : vector<8x1xf32> -> vector<8x1xf32>
    %cst_18 = arith.constant dense<0.000000e+00> : vector<8x8xf32>
    %41 = tpu.matmul %37, %28, %cst_18 {dimension_numbers = #tpu.dot_dimension_numbers<[1], [0], [0], [1], [0, 0, 1, 1], [], []>} : vector<8x8xf32>, vector<8x8xf32>, vector<8x8xf32> -> vector<8x8xf32>
    %42 = vector.broadcast %40 : vector<8x1xf32> to vector<8x8xf32>
    %43 = arith.mulf %41, %42 : vector<8x8xf32>
    %c0_19 = arith.constant 0 : index
    %c8 = arith.constant 8 : index
    %44 = vector.load %arg18[%c0_19, %c8] : memref<8x32xf32, #tpu.memory_space<vmem>>, vector<8x8xf32>
    tpu.vector_store %arg18[%c0_19, %c8], %43 {strides = array<i32>} : memref<8x32xf32, #tpu.memory_space<vmem>>, vector<8x8xf32>,
    %45 = vector.extract_strided_slice %5 {offsets = [0, 16], sizes = [8, 8], strides = [1, 1]} : vector<8x96xf32> to vector<8x8xf32>
    %46 = vector.extract_strided_slice %5 {offsets = [0, 48], sizes = [8, 8], strides = [1, 1]} : vector<8x96xf32> to vector<8x8xf32>
    %47 = vector.extract_strided_slice %5 {offsets = [0, 80], sizes = [8, 8], strides = [1, 1]} : vector<8x96xf32> to vector<8x8xf32>
    %cst_20 = arith.constant dense<0.000000e+00> : vector<8x8xf32>
    %48 = tpu.matmul %45, %46, %cst_20 {dimension_numbers = #tpu.dot_dimension_numbers<[1], [1], [0], [0], [0, 0, 1, 0], [], []>} : vector<8x8xf32>, vector<8x8xf32>, vector<8x8xf32> -> vector<8x8xf32>
    %cst_21 = arith.constant 0.353553385 : f32
    %49 = vector.broadcast %cst_21 : f32 to vector<8x8xf32>
    %50 = arith.mulf %48, %49 : vector<8x8xf32>
    %51 = arith.addf %50, %6 : vector<8x8xf32>
    %cst_22 = arith.constant dense<0xFF800000> : vector<8xf32>
    %52 = vector.multi_reduction <maximumf>, %51, %cst_22 [1] : vector<8x8xf32> to vector<8xf32>
    %53 = vector.shape_cast %52 : vector<8xf32> to vector<8x1xf32>
    %54 = vector.broadcast %53 : vector<8x1xf32> to vector<8x8xf32>
    %55 = arith.subf %51, %54 : vector<8x8xf32>
    %56 = math.exp %55 : vector<8x8xf32>
    %cst_23 = arith.constant dense<0.000000e+00> : vector<8xf32>
    %57 = vector.multi_reduction <add>, %56, %cst_23 [1] : vector<8x8xf32> to vector<8xf32>
    %58 = vector.shape_cast %57 : vector<8xf32> to vector<8x1xf32>
    %59 = tpu.reciprocal %58 {approx = true} : vector<8x1xf32> -> vector<8x1xf32>
    %cst_24 = arith.constant dense<0.000000e+00> : vector<8x8xf32>
    %60 = tpu.matmul %56, %47, %cst_24 {dimension_numbers = #tpu.dot_dimension_numbers<[1], [0], [0], [1], [0, 0, 1, 1], [], []>} : vector<8x8xf32>, vector<8x8xf32>, vector<8x8xf32> -> vector<8x8xf32>
    %61 = vector.broadcast %59 : vector<8x1xf32> to vector<8x8xf32>
    %62 = arith.mulf %60, %61 : vector<8x8xf32>
    %c0_25 = arith.constant 0 : index
    %c16 = arith.constant 16 : index
    %63 = vector.load %arg18[%c0_25, %c16] : memref<8x32xf32, #tpu.memory_space<vmem>>, vector<8x8xf32>
    tpu.vector_store %arg18[%c0_25, %c16], %62 {strides = array<i32>} : memref<8x32xf32, #tpu.memory_space<vmem>>, vector<8x8xf32>,
    %64 = vector.extract_strided_slice %5 {offsets = [0, 24], sizes = [8, 8], strides = [1, 1]} : vector<8x96xf32> to vector<8x8xf32>
    %65 = vector.extract_strided_slice %5 {offsets = [0, 56], sizes = [8, 8], strides = [1, 1]} : vector<8x96xf32> to vector<8x8xf32>
    %66 = vector.extract_strided_slice %5 {offsets = [0, 88], sizes = [8, 8], strides = [1, 1]} : vector<8x96xf32> to vector<8x8xf32>
    %cst_26 = arith.constant dense<0.000000e+00> : vector<8x8xf32>
    %67 = tpu.matmul %64, %65, %cst_26 {dimension_numbers = #tpu.dot_dimension_numbers<[1], [1], [0], [0], [0, 0, 1, 0], [], []>} : vector<8x8xf32>, vector<8x8xf32>, vector<8x8xf32> -> vector<8x8xf32>
    %cst_27 = arith.constant 0.353553385 : f32
    %68 = vector.broadcast %cst_27 : f32 to vector<8x8xf32>
    %69 = arith.mulf %67, %68 : vector<8x8xf32>
    %70 = arith.addf %69, %6 : vector<8x8xf32>
    %cst_28 = arith.constant dense<0xFF800000> : vector<8xf32>
    %71 = vector.multi_reduction <maximumf>, %70, %cst_28 [1] : vector<8x8xf32> to vector<8xf32>
    %72 = vector.shape_cast %71 : vector<8xf32> to vector<8x1xf32>
    %73 = vector.broadcast %72 : vector<8x1xf32> to vector<8x8xf32>
    %74 = arith.subf %70, %73 : vector<8x8xf32>
    %75 = math.exp %74 : vector<8x8xf32>
    %cst_29 = arith.constant dense<0.000000e+00> : vector<8xf32>
    %76 = vector.multi_reduction <add>, %75, %cst_29 [1] : vector<8x8xf32> to vector<8xf32>
    %77 = vector.shape_cast %76 : vector<8xf32> to vector<8x1xf32>
    %78 = tpu.reciprocal %77 {approx = true} : vector<8x1xf32> -> vector<8x1xf32>
    %cst_30 = arith.constant dense<0.000000e+00> : vector<8x8xf32>
    %79 = tpu.matmul %75, %66, %cst_30 {dimension_numbers = #tpu.dot_dimension_numbers<[1], [0], [0], [1], [0, 0, 1, 1], [], []>} : vector<8x8xf32>, vector<8x8xf32>, vector<8x8xf32> -> vector<8x8xf32>
    %80 = vector.broadcast %78 : vector<8x1xf32> to vector<8x8xf32>
    %81 = arith.mulf %79, %80 : vector<8x8xf32>
    %c0_31 = arith.constant 0 : index
    %c24 = arith.constant 24 : index
    %82 = vector.load %arg18[%c0_31, %c24] : memref<8x32xf32, #tpu.memory_space<vmem>>, vector<8x8xf32>
    tpu.vector_store %arg18[%c0_31, %c24], %81 {strides = array<i32>} : memref<8x32xf32, #tpu.memory_space<vmem>>, vector<8x8xf32>,
    %c0_32 = arith.constant 0 : index
    %c0_33 = arith.constant 0 : index
    %83 = vector.load %arg18[%c0_32, %c0_33] : memref<8x32xf32, #tpu.memory_space<vmem>>, vector<8x32xf32>
    %c0_34 = arith.constant 0 : index
    %c0_35 = arith.constant 0 : index
    %84 = vector.load %arg5[%c0_34, %c0_35] : memref<32x32xf32, #tpu.memory_space<vmem>>, vector<32x32xf32>
    %cst_36 = arith.constant dense<0.000000e+00> : vector<8x32xf32>
    %85 = tpu.matmul %83, %84, %cst_36 {dimension_numbers = #tpu.dot_dimension_numbers<[1], [0], [0], [1], [0, 0, 1, 1], [], []>} : vector<8x32xf32>, vector<32x32xf32>, vector<8x32xf32> -> vector<8x32xf32>
    %c0_37 = arith.constant 0 : index
    %c0_38 = arith.constant 0 : index
    %86 = vector.load %arg6[%c0_37, %c0_38] : memref<1x32xf32, #tpu.memory_space<vmem>>, vector<1x32xf32>
    %87 = vector.broadcast %86 : vector<1x32xf32> to vector<8x32xf32>
    %88 = arith.addf %85, %87 : vector<8x32xf32>
    %89 = arith.addf %0, %88 : vector<8x32xf32>
    %c0_39 = arith.constant 0 : index
    %c0_40 = arith.constant 0 : index
    %90 = vector.load %arg11[%c0_39, %c0_40] : memref<1x32xf32, #tpu.memory_space<vmem>>, vector<1x32xf32>
    %c0_41 = arith.constant 0 : index
    %c0_42 = arith.constant 0 : index
    %91 = vector.load %arg12[%c0_41, %c0_42] : memref<1x32xf32, #tpu.memory_space<vmem>>, vector<1x32xf32>
    %cst_43 = arith.constant dense<0.000000e+00> : vector<8xf32>
    %92 = vector.multi_reduction <add>, %89, %cst_43 [1] : vector<8x32xf32> to vector<8xf32>
    %93 = vector.shape_cast %92 : vector<8xf32> to vector<8x1xf32>
    %cst_44 = arith.constant 3.200000e+01 : f32
    %94 = vector.broadcast %cst_44 : f32 to vector<8x1xf32>
    %95 = arith.divf %93, %94 : vector<8x1xf32>
    %96 = vector.broadcast %95 : vector<8x1xf32> to vector<8x32xf32>
    %97 = arith.subf %89, %96 : vector<8x32xf32>
    %98 = arith.mulf %97, %97 : vector<8x32xf32>
    %cst_45 = arith.constant dense<0.000000e+00> : vector<8xf32>
    %99 = vector.multi_reduction <add>, %98, %cst_45 [1] : vector<8x32xf32> to vector<8xf32>
    %100 = vector.shape_cast %99 : vector<8xf32> to vector<8x1xf32>
    %cst_46 = arith.constant 3.200000e+01 : f32
    %101 = vector.broadcast %cst_46 : f32 to vector<8x1xf32>
    %102 = arith.divf %100, %101 : vector<8x1xf32>
    %103 = vector.broadcast %95 : vector<8x1xf32> to vector<8x32xf32>
    %104 = arith.subf %89, %103 : vector<8x32xf32>
    %cst_47 = arith.constant 9.99999974E-6 : f32
    %105 = vector.broadcast %cst_47 : f32 to vector<8x1xf32>
    %106 = arith.addf %102, %105 : vector<8x1xf32>
    %107 = math.rsqrt %106 : vector<8x1xf32>
    %108 = vector.broadcast %107 : vector<8x1xf32> to vector<8x32xf32>
    %109 = arith.mulf %104, %108 : vector<8x32xf32>
    %110 = vector.broadcast %90 : vector<1x32xf32> to vector<8x32xf32>
    %111 = arith.mulf %109, %110 : vector<8x32xf32>
    %112 = vector.broadcast %91 : vector<1x32xf32> to vector<8x32xf32>
    %113 = arith.addf %111, %112 : vector<8x32xf32>
    %c0_48 = arith.constant 0 : index
    %c0_49 = arith.constant 0 : index
    %114 = vector.load %arg7[%c0_48, %c0_49] : memref<32x128xf32, #tpu.memory_space<vmem>>, vector<32x128xf32>
    %cst_50 = arith.constant dense<0.000000e+00> : vector<8x128xf32>
    %115 = tpu.matmul %113, %114, %cst_50 {dimension_numbers = #tpu.dot_dimension_numbers<[1], [0], [0], [1], [0, 0, 1, 1], [], []>} : vector<8x32xf32>, vector<32x128xf32>, vector<8x128xf32> -> vector<8x128xf32>
    %c0_51 = arith.constant 0 : index
    %c0_52 = arith.constant 0 : index
    %116 = vector.load %arg8[%c0_51, %c0_52] : memref<1x128xf32, #tpu.memory_space<vmem>>, vector<1x128xf32>
    %117 = vector.broadcast %116 : vector<1x128xf32> to vector<8x128xf32>
    %118 = arith.addf %115, %117 : vector<8x128xf32>
    %cst_53 = arith.constant 0.000000e+00 : f32
    %119 = vector.broadcast %cst_53 : f32 to vector<8x128xf32>
    %120 = arith.maximumf %118, %119 : vector<8x128xf32>
    %c0_54 = arith.constant 0 : index
    %c0_55 = arith.constant 0 : index
    %121 = vector.load %arg9[%c0_54, %c0_55] : memref<128x32xf32, #tpu.memory_space<vmem>>, vector<128x32xf32>
    %cst_56 = arith.constant dense<0.000000e+00> : vector<8x32xf32>
    %122 = tpu.matmul %120, %121, %cst_56 {dimension_numbers = #tpu.dot_dimension_numbers<[1], [0], [0], [1], [0, 0, 1, 1], [], []>} : vector<8x128xf32>, vector<128x32xf32>, vector<8x32xf32> -> vector<8x32xf32>
    %c0_57 = arith.constant 0 : index
    %c0_58 = arith.constant 0 : index
    %123 = vector.load %arg10[%c0_57, %c0_58] : memref<1x32xf32, #tpu.memory_space<vmem>>, vector<1x32xf32>
    %124 = vector.broadcast %123 : vector<1x32xf32> to vector<8x32xf32>
    %125 = arith.addf %122, %124 : vector<8x32xf32>
    %126 = arith.addf %113, %125 : vector<8x32xf32>
    %c0_59 = arith.constant 0 : index
    %c0_60 = arith.constant 0 : index
    %127 = vector.load %arg13[%c0_59, %c0_60] : memref<1x32xf32, #tpu.memory_space<vmem>>, vector<1x32xf32>
    %c0_61 = arith.constant 0 : index
    %c0_62 = arith.constant 0 : index
    %128 = vector.load %arg14[%c0_61, %c0_62] : memref<1x32xf32, #tpu.memory_space<vmem>>, vector<1x32xf32>
    %cst_63 = arith.constant dense<0.000000e+00> : vector<8xf32>
    %129 = vector.multi_reduction <add>, %126, %cst_63 [1] : vector<8x32xf32> to vector<8xf32>
    %130 = vector.shape_cast %129 : vector<8xf32> to vector<8x1xf32>
    %cst_64 = arith.constant 3.200000e+01 : f32
    %131 = vector.broadcast %cst_64 : f32 to vector<8x1xf32>
    %132 = arith.divf %130, %131 : vector<8x1xf32>
    %133 = vector.broadcast %132 : vector<8x1xf32> to vector<8x32xf32>
    %134 = arith.subf %126, %133 : vector<8x32xf32>
    %135 = arith.mulf %134, %134 : vector<8x32xf32>
    %cst_65 = arith.constant dense<0.000000e+00> : vector<8xf32>
    %136 = vector.multi_reduction <add>, %135, %cst_65 [1] : vector<8x32xf32> to vector<8xf32>
    %137 = vector.shape_cast %136 : vector<8xf32> to vector<8x1xf32>
    %cst_66 = arith.constant 3.200000e+01 : f32
    %138 = vector.broadcast %cst_66 : f32 to vector<8x1xf32>
    %139 = arith.divf %137, %138 : vector<8x1xf32>
    %140 = vector.broadcast %132 : vector<8x1xf32> to vector<8x32xf32>
    %141 = arith.subf %126, %140 : vector<8x32xf32>
    %cst_67 = arith.constant 9.99999974E-6 : f32
    %142 = vector.broadcast %cst_67 : f32 to vector<8x1xf32>
    %143 = arith.addf %139, %142 : vector<8x1xf32>
    %144 = math.rsqrt %143 : vector<8x1xf32>
    %145 = vector.broadcast %144 : vector<8x1xf32> to vector<8x32xf32>
    %146 = arith.mulf %141, %145 : vector<8x32xf32>
    %147 = vector.broadcast %127 : vector<1x32xf32> to vector<8x32xf32>
    %148 = arith.mulf %146, %147 : vector<8x32xf32>
    %149 = vector.broadcast %128 : vector<1x32xf32> to vector<8x32xf32>
    %150 = arith.addf %148, %149 : vector<8x32xf32>
    %c0_68 = arith.constant 0 : index
    %c0_69 = arith.constant 0 : index
    %151 = vector.load %arg15[%c0_68, %c0_69] : memref<1x32xf32, #tpu.memory_space<vmem>>, vector<1x32xf32>
    %c0_70 = arith.constant 0 : index
    %c0_71 = arith.constant 0 : index
    %152 = vector.load %arg16[%c0_70, %c0_71] : memref<1x32xf32, #tpu.memory_space<vmem>>, vector<1x32xf32>
    %cst_72 = arith.constant dense<0.000000e+00> : vector<8xf32>
    %153 = vector.multi_reduction <add>, %150, %cst_72 [1] : vector<8x32xf32> to vector<8xf32>
    %154 = vector.shape_cast %153 : vector<8xf32> to vector<8x1xf32>
    %cst_73 = arith.constant 3.200000e+01 : f32
    %155 = vector.broadcast %cst_73 : f32 to vector<8x1xf32>
    %156 = arith.divf %154, %155 : vector<8x1xf32>
    %157 = vector.broadcast %156 : vector<8x1xf32> to vector<8x32xf32>
    %158 = arith.subf %150, %157 : vector<8x32xf32>
    %159 = arith.mulf %158, %158 : vector<8x32xf32>
    %cst_74 = arith.constant dense<0.000000e+00> : vector<8xf32>
    %160 = vector.multi_reduction <add>, %159, %cst_74 [1] : vector<8x32xf32> to vector<8xf32>
    %161 = vector.shape_cast %160 : vector<8xf32> to vector<8x1xf32>
    %cst_75 = arith.constant 3.200000e+01 : f32
    %162 = vector.broadcast %cst_75 : f32 to vector<8x1xf32>
    %163 = arith.divf %161, %162 : vector<8x1xf32>
    %164 = vector.broadcast %156 : vector<8x1xf32> to vector<8x32xf32>
    %165 = arith.subf %150, %164 : vector<8x32xf32>
    %cst_76 = arith.constant 9.99999974E-6 : f32
    %166 = vector.broadcast %cst_76 : f32 to vector<8x1xf32>
    %167 = arith.addf %163, %166 : vector<8x1xf32>
    %168 = math.rsqrt %167 : vector<8x1xf32>
    %169 = vector.broadcast %168 : vector<8x1xf32> to vector<8x32xf32>
    %170 = arith.mulf %165, %169 : vector<8x32xf32>
    %171 = vector.broadcast %151 : vector<1x32xf32> to vector<8x32xf32>
    %172 = arith.mulf %170, %171 : vector<8x32xf32>
    %173 = vector.broadcast %152 : vector<1x32xf32> to vector<8x32xf32>
    %174 = arith.addf %172, %173 : vector<8x32xf32>
    %c0_77 = arith.constant 0 : index
    %c0_78 = arith.constant 0 : index
    %175 = vector.load %arg17[%c0_77, %c0_78] : memref<8x32xf32, #tpu.memory_space<vmem>>, vector<8x32xf32>
    tpu.vector_store %arg17[%c0_77, %c0_78], %174 {strides = array<i32>} : memref<8x32xf32, #tpu.memory_space<vmem>>, vector<8x32xf32>,
    return
  }
  func.func @transform_0(%arg0: i32) -> (i32, i32) {
    %c0_i32 = arith.constant 0 : i32
    %c0_i32_0 = arith.constant 0 : i32
    return %arg0, %c0_i32 : i32, i32
  }
  func.func @transform_1(%arg0: i32) -> (i32, i32) {
    %c0_i32 = arith.constant 0 : i32
    %c0_i32_0 = arith.constant 0 : i32
    %c0_i32_1 = arith.constant 0 : i32
    return %c0_i32, %c0_i32_0 : i32, i32
  }
  func.func @transform_2(%arg0: i32) -> (i32, i32) {
    %c0_i32 = arith.constant 0 : i32
    %c0_i32_0 = arith.constant 0 : i32
    %c0_i32_1 = arith.constant 0 : i32
    return %c0_i32, %c0_i32_0 : i32, i32
  }
  func.func @transform_3(%arg0: i32) -> (i32, i32) {
    %c0_i32 = arith.constant 0 : i32
    %c0_i32_0 = arith.constant 0 : i32
    %c0_i32_1 = arith.constant 0 : i32
    return %c0_i32, %c0_i32_0 : i32, i32
  }
  func.func @transform_4(%arg0: i32) -> (i32, i32) {
    %c0_i32 = arith.constant 0 : i32
    %c0_i32_0 = arith.constant 0 : i32
    %c0_i32_1 = arith.constant 0 : i32
    return %c0_i32, %c0_i32_0 : i32, i32
  }
  func.func @transform_5(%arg0: i32) -> (i32, i32) {
    %c0_i32 = arith.constant 0 : i32
    %c0_i32_0 = arith.constant 0 : i32
    %c0_i32_1 = arith.constant 0 : i32
    return %c0_i32, %c0_i32_0 : i32, i32
  }
  func.func @transform_6(%arg0: i32) -> (i32, i32) {
    %c0_i32 = arith.constant 0 : i32
    %c0_i32_0 = arith.constant 0 : i32
    %c0_i32_1 = arith.constant 0 : i32
    return %c0_i32, %c0_i32_0 : i32, i32
  }
  func.func @transform_7(%arg0: i32) -> (i32, i32) {
    %c0_i32 = arith.constant 0 : i32
    %c0_i32_0 = arith.constant 0 : i32
    %c0_i32_1 = arith.constant 0 : i32
    return %c0_i32, %c0_i32_0 : i32, i32
  }
  func.func @transform_8(%arg0: i32) -> (i32, i32) {
    %c0_i32 = arith.constant 0 : i32
    %c0_i32_0 = arith.constant 0 : i32
    %c0_i32_1 = arith.constant 0 : i32
    return %c0_i32, %c0_i32_0 : i32, i32
  }
  func.func @transform_9(%arg0: i32) -> (i32, i32) {
    %c0_i32 = arith.constant 0 : i32
    %c0_i32_0 = arith.constant 0 : i32
    %c0_i32_1 = arith.constant 0 : i32
    return %c0_i32, %c0_i32_0 : i32, i32
  }
  func.func @transform_10(%arg0: i32) -> (i32, i32) {
    %c0_i32 = arith.constant 0 : i32
    %c0_i32_0 = arith.constant 0 : i32
    %c0_i32_1 = arith.constant 0 : i32
    return %c0_i32, %c0_i32_0 : i32, i32
  }
  func.func @transform_11(%arg0: i32) -> (i32, i32) {
    %c0_i32 = arith.constant 0 : i32
    %c0_i32_0 = arith.constant 0 : i32
    %c0_i32_1 = arith.constant 0 : i32
    return %c0_i32, %c0_i32_0 : i32, i32
  }
  func.func @transform_12(%arg0: i32) -> (i32, i32) {
    %c0_i32 = arith.constant 0 : i32
    %c0_i32_0 = arith.constant 0 : i32
    %c0_i32_1 = arith.constant 0 : i32
    return %c0_i32, %c0_i32_0 : i32, i32
  }
  func.func @transform_13(%arg0: i32) -> (i32, i32) {
    %c0_i32 = arith.constant 0 : i32
    %c0_i32_0 = arith.constant 0 : i32
    %c0_i32_1 = arith.constant 0 : i32
    return %c0_i32, %c0_i32_0 : i32, i32
  }
  func.func @transform_14(%arg0: i32) -> (i32, i32) {
    %c0_i32 = arith.constant 0 : i32
    %c0_i32_0 = arith.constant 0 : i32
    %c0_i32_1 = arith.constant 0 : i32
    return %c0_i32, %c0_i32_0 : i32, i32
  }
  func.func @transform_15(%arg0: i32) -> (i32, i32) {
    %c0_i32 = arith.constant 0 : i32
    %c0_i32_0 = arith.constant 0 : i32
    %c0_i32_1 = arith.constant 0 : i32
    return %c0_i32, %c0_i32_0 : i32, i32
  }
  func.func @transform_16(%arg0: i32) -> (i32, i32) {
    %c0_i32 = arith.constant 0 : i32
    %c0_i32_0 = arith.constant 0 : i32
    return %arg0, %c0_i32 : i32, i32
  }
}

module attributes {stable_mosaic.version = 11 : i64} {
  func.func @encoder_layer_kernel(%arg0: i32, %arg1: memref<8x32xf32, #tpu.memory_space<vmem>>, %arg2: memref<8x8xf32, #tpu.memory_space<vmem>>, %arg3: memref<32x96xf32, #tpu.memory_space<vmem>>, %arg4: memref<1x96xf32, #tpu.memory_space<vmem>>, %arg5: memref<32x32xf32, #tpu.memory_space<vmem>>, %arg6: memref<1x32xf32, #tpu.memory_space<vmem>>, %arg7: memref<32x128xf32, #tpu.memory_space<vmem>>, %arg8: memref<1x128xf32, #tpu.memory_space<vmem>>, %arg9: memref<128x32xf32, #tpu.memory_space<vmem>>, %arg10: memref<1x32xf32, #tpu.memory_space<vmem>>, %arg11: memref<1x32xf32, #tpu.memory_space<vmem>>, %arg12: memref<1x32xf32, #tpu.memory_space<vmem>>, %arg13: memref<1x32xf32, #tpu.memory_space<vmem>>, %arg14: memref<1x32xf32, #tpu.memory_space<vmem>>, %arg15: memref<1x32xf32, #tpu.memory_space<vmem>>, %arg16: memref<1x32xf32, #tpu.memory_space<vmem>>, %arg17: memref<8x32xf32, #tpu.memory_space<vmem>>, %arg18: memref<8x32xf32, #tpu.memory_space<vmem>>) attributes {dimension_semantics = [#tpu.dimension_semantics<parallel>], iteration_bounds = array<i64: 2>, scalar_prefetch = 0 : i64, scratch_operands = 1 : i64, tpu.core_type = #tpu.core_type<tc>, window_params = [{transform_indices = @transform_0, window_bounds = array<i64: 8, 32>}, {pipeline_mode = #tpu.pipeline_mode<synchronous>, transform_indices = @transform_1, window_bounds = array<i64: 8, 8>}, {pipeline_mode = #tpu.pipeline_mode<synchronous>, transform_indices = @transform_2, window_bounds = array<i64: 32, 96>}, {pipeline_mode = #tpu.pipeline_mode<synchronous>, transform_indices = @transform_3, window_bounds = array<i64: 1, 96>}, {pipeline_mode = #tpu.pipeline_mode<synchronous>, transform_indices = @transform_4, window_bounds = array<i64: 32, 32>}, {pipeline_mode = #tpu.pipeline_mode<synchronous>, transform_indices = @transform_5, window_bounds = array<i64: 1, 32>}, {pipeline_mode = #tpu.pipeline_mode<synchronous>, transform_indices = @transform_6, window_bounds = array<i64: 32, 128>}, {pipeline_mode = #tpu.pipeline_mode<synchronous>, transform_indices = @transform_7, window_bounds = array<i64: 1, 128>}, {pipeline_mode = #tpu.pipeline_mode<synchronous>, transform_indices = @transform_8, window_bounds = array<i64: 128, 32>}, {pipeline_mode = #tpu.pipeline_mode<synchronous>, transform_indices = @transform_9, window_bounds = array<i64: 1, 32>}, {pipeline_mode = #tpu.pipeline_mode<synchronous>, transform_indices = @transform_10, window_bounds = array<i64: 1, 32>}, {pipeline_mode = #tpu.pipeline_mode<synchronous>, transform_indices = @transform_11, window_bounds = array<i64: 1, 32>}, {pipeline_mode = #tpu.pipeline_mode<synchronous>, transform_indices = @transform_12, window_bounds = array<i64: 1, 32>}, {pipeline_mode = #tpu.pipeline_mode<synchronous>, transform_indices = @transform_13, window_bounds = array<i64: 1, 32>}, {pipeline_mode = #tpu.pipeline_mode<synchronous>, transform_indices = @transform_14, window_bounds = array<i64: 1, 32>}, {pipeline_mode = #tpu.pipeline_mode<synchronous>, transform_indices = @transform_15, window_bounds = array<i64: 1, 32>}, {transform_indices = @transform_16, window_bounds = array<i64: 8, 32>}]} {
    %c0 = arith.constant 0 : index
    %c0_0 = arith.constant 0 : index
    %0 = vector.load %arg1[%c0, %c0_0] : memref<8x32xf32, #tpu.memory_space<vmem>>, vector<8x32xf32>
    %c0_1 = arith.constant 0 : index
    %c0_2 = arith.constant 0 : index
    %1 = vector.load %arg3[%c0_1, %c0_2] : memref<32x96xf32, #tpu.memory_space<vmem>>, vector<32x96xf32>
    %cst = arith.constant dense<0.000000e+00> : vector<8x96xf32>
    %2 = tpu.matmul %0, %1, %cst {dimension_numbers = #tpu.dot_dimension_numbers<[1], [0], [0], [1], [0, 0, 1, 1], [], []>} : vector<8x32xf32>, vector<32x96xf32>, vector<8x96xf32> -> vector<8x96xf32>
    %c0_3 = arith.constant 0 : index
    %c0_4 = arith.constant 0 : index
    %3 = vector.load %arg4[%c0_3, %c0_4] : memref<1x96xf32, #tpu.memory_space<vmem>>, vector<1x96xf32>
    %4 = vector.broadcast %3 : vector<1x96xf32> to vector<8x96xf32>
    %5 = arith.addf %2, %4 : vector<8x96xf32>
    %c0_5 = arith.constant 0 : index
    %c0_6 = arith.constant 0 : index
    %6 = vector.load %arg2[%c0_5, %c0_6] : memref<8x8xf32, #tpu.memory_space<vmem>>, vector<8x8xf32>
    %7 = vector.extract_strided_slice %5 {offsets = [0, 0], sizes = [8, 8], strides = [1, 1]} : vector<8x96xf32> to vector<8x8xf32>
    %8 = vector.extract_strided_slice %5 {offsets = [0, 32], sizes = [8, 8], strides = [1, 1]} : vector<8x96xf32> to vector<8x8xf32>
    %9 = vector.extract_strided_slice %5 {offsets = [0, 64], sizes = [8, 8], strides = [1, 1]} : vector<8x96xf32> to vector<8x8xf32>
    %cst_7 = arith.constant dense<0.000000e+00> : vector<8x8xf32>
    %10 = tpu.matmul %7, %8, %cst_7 {dimension_numbers = #tpu.dot_dimension_numbers<[1], [1], [0], [0], [0, 0, 1, 0], [], []>} : vector<8x8xf32>, vector<8x8xf32>, vector<8x8xf32> -> vector<8x8xf32>
    %cst_8 = arith.constant 0.353553385 : f32
    %11 = vector.broadcast %cst_8 : f32 to vector<8x8xf32>
    %12 = arith.mulf %10, %11 : vector<8x8xf32>
    %13 = arith.addf %12, %6 : vector<8x8xf32>
    %cst_9 = arith.constant dense<0xFF800000> : vector<8xf32>
    %14 = vector.multi_reduction <maximumf>, %13, %cst_9 [1] : vector<8x8xf32> to vector<8xf32>
    %15 = vector.shape_cast %14 : vector<8xf32> to vector<8x1xf32>
    %16 = vector.broadcast %15 : vector<8x1xf32> to vector<8x8xf32>
    %17 = arith.subf %13, %16 : vector<8x8xf32>
    %18 = math.exp %17 : vector<8x8xf32>
    %cst_10 = arith.constant dense<0.000000e+00> : vector<8xf32>
    %19 = vector.multi_reduction <add>, %18, %cst_10 [1] : vector<8x8xf32> to vector<8xf32>
    %20 = vector.shape_cast %19 : vector<8xf32> to vector<8x1xf32>
    %21 = tpu.reciprocal %20 {approx = true} : vector<8x1xf32> -> vector<8x1xf32>
    %cst_11 = arith.constant dense<0.000000e+00> : vector<8x8xf32>
    %22 = tpu.matmul %18, %9, %cst_11 {dimension_numbers = #tpu.dot_dimension_numbers<[1], [0], [0], [1], [0, 0, 1, 1], [], []>} : vector<8x8xf32>, vector<8x8xf32>, vector<8x8xf32> -> vector<8x8xf32>
    %23 = vector.broadcast %21 : vector<8x1xf32> to vector<8x8xf32>
    %24 = arith.mulf %22, %23 : vector<8x8xf32>
    %c0_12 = arith.constant 0 : index
    %c0_13 = arith.constant 0 : index
    %25 = vector.load %arg18[%c0_12, %c0_13] : memref<8x32xf32, #tpu.memory_space<vmem>>, vector<8x8xf32>
    tpu.vector_store %arg18[%c0_12, %c0_13], %24 {strides = array<i32>} : memref<8x32xf32, #tpu.memory_space<vmem>>, vector<8x8xf32>,
    %26 = vector.extract_strided_slice %5 {offsets = [0, 8], sizes = [8, 8], strides = [1, 1]} : vector<8x96xf32> to vector<8x8xf32>
    %27 = vector.extract_strided_slice %5 {offsets = [0, 40], sizes = [8, 8], strides = [1, 1]} : vector<8x96xf32> to vector<8x8xf32>
    %28 = vector.extract_strided_slice %5 {offsets = [0, 72], sizes = [8, 8], strides = [1, 1]} : vector<8x96xf32> to vector<8x8xf32>
    %cst_14 = arith.constant dense<0.000000e+00> : vector<8x8xf32>
    %29 = tpu.matmul %26, %27, %cst_14 {dimension_numbers = #tpu.dot_dimension_numbers<[1], [1], [0], [0], [0, 0, 1, 0], [], []>} : vector<8x8xf32>, vector<8x8xf32>, vector<8x8xf32> -> vector<8x8xf32>
    %cst_15 = arith.constant 0.353553385 : f32
    %30 = vector.broadcast %cst_15 : f32 to vector<8x8xf32>
    %31 = arith.mulf %29, %30 : vector<8x8xf32>
    %32 = arith.addf %31, %6 : vector<8x8xf32>
    %cst_16 = arith.constant dense<0xFF800000> : vector<8xf32>
    %33 = vector.multi_reduction <maximumf>, %32, %cst_16 [1] : vector<8x8xf32> to vector<8xf32>
    %34 = vector.shape_cast %33 : vector<8xf32> to vector<8x1xf32>
    %35 = vector.broadcast %34 : vector<8x1xf32> to vector<8x8xf32>
    %36 = arith.subf %32, %35 : vector<8x8xf32>
    %37 = math.exp %36 : vector<8x8xf32>
    %cst_17 = arith.constant dense<0.000000e+00> : vector<8xf32>
    %38 = vector.multi_reduction <add>, %37, %cst_17 [1] : vector<8x8xf32> to vector<8xf32>
    %39 = vector.shape_cast %38 : vector<8xf32> to vector<8x1xf32>
    %40 = tpu.reciprocal %39 {approx = true} : vector<8x1xf32> -> vector<8x1xf32>
    %cst_18 = arith.constant dense<0.000000e+00> : vector<8x8xf32>
    %41 = tpu.matmul %37, %28, %cst_18 {dimension_numbers = #tpu.dot_dimension_numbers<[1], [0], [0], [1], [0, 0, 1, 1], [], []>} : vector<8x8xf32>, vector<8x8xf32>, vector<8x8xf32> -> vector<8x8xf32>
    %42 = vector.broadcast %40 : vector<8x1xf32> to vector<8x8xf32>
    %43 = arith.mulf %41, %42 : vector<8x8xf32>
    %c0_19 = arith.constant 0 : index
    %c8 = arith.constant 8 : index
    %44 = vector.load %arg18[%c0_19, %c8] : memref<8x32xf32, #tpu.memory_space<vmem>>, vector<8x8xf32>
    tpu.vector_store %arg18[%c0_19, %c8], %43 {strides = array<i32>} : memref<8x32xf32, #tpu.memory_space<vmem>>, vector<8x8xf32>,
    %45 = vector.extract_strided_slice %5 {offsets = [0, 16], sizes = [8, 8], strides = [1, 1]} : vector<8x96xf32> to vector<8x8xf32>
    %46 = vector.extract_strided_slice %5 {offsets = [0, 48], sizes = [8, 8], strides = [1, 1]} : vector<8x96xf32> to vector<8x8xf32>
    %47 = vector.extract_strided_slice %5 {offsets = [0, 80], sizes = [8, 8], strides = [1, 1]} : vector<8x96xf32> to vector<8x8xf32>
    %cst_20 = arith.constant dense<0.000000e+00> : vector<8x8xf32>
    %48 = tpu.matmul %45, %46, %cst_20 {dimension_numbers = #tpu.dot_dimension_numbers<[1], [1], [0], [0], [0, 0, 1, 0], [], []>} : vector<8x8xf32>, vector<8x8xf32>, vector<8x8xf32> -> vector<8x8xf32>
    %cst_21 = arith.constant 0.353553385 : f32
    %49 = vector.broadcast %cst_21 : f32 to vector<8x8xf32>
    %50 = arith.mulf %48, %49 : vector<8x8xf32>
    %51 = arith.addf %50, %6 : vector<8x8xf32>
    %cst_22 = arith.constant dense<0xFF800000> : vector<8xf32>
    %52 = vector.multi_reduction <maximumf>, %51, %cst_22 [1] : vector<8x8xf32> to vector<8xf32>
    %53 = vector.shape_cast %52 : vector<8xf32> to vector<8x1xf32>
    %54 = vector.broadcast %53 : vector<8x1xf32> to vector<8x8xf32>
    %55 = arith.subf %51, %54 : vector<8x8xf32>
    %56 = math.exp %55 : vector<8x8xf32>
    %cst_23 = arith.constant dense<0.000000e+00> : vector<8xf32>
    %57 = vector.multi_reduction <add>, %56, %cst_23 [1] : vector<8x8xf32> to vector<8xf32>
    %58 = vector.shape_cast %57 : vector<8xf32> to vector<8x1xf32>
    %59 = tpu.reciprocal %58 {approx = true} : vector<8x1xf32> -> vector<8x1xf32>
    %cst_24 = arith.constant dense<0.000000e+00> : vector<8x8xf32>
    %60 = tpu.matmul %56, %47, %cst_24 {dimension_numbers = #tpu.dot_dimension_numbers<[1], [0], [0], [1], [0, 0, 1, 1], [], []>} : vector<8x8xf32>, vector<8x8xf32>, vector<8x8xf32> -> vector<8x8xf32>
    %61 = vector.broadcast %59 : vector<8x1xf32> to vector<8x8xf32>
    %62 = arith.mulf %60, %61 : vector<8x8xf32>
    %c0_25 = arith.constant 0 : index
    %c16 = arith.constant 16 : index
    %63 = vector.load %arg18[%c0_25, %c16] : memref<8x32xf32, #tpu.memory_space<vmem>>, vector<8x8xf32>
    tpu.vector_store %arg18[%c0_25, %c16], %62 {strides = array<i32>} : memref<8x32xf32, #tpu.memory_space<vmem>>, vector<8x8xf32>,
    %64 = vector.extract_strided_slice %5 {offsets = [0, 24], sizes = [8, 8], strides = [1, 1]} : vector<8x96xf32> to vector<8x8xf32>
    %65 = vector.extract_strided_slice %5 {offsets = [0, 56], sizes = [8, 8], strides = [1, 1]} : vector<8x96xf32> to vector<8x8xf32>
    %66 = vector.extract_strided_slice %5 {offsets = [0, 88], sizes = [8, 8], strides = [1, 1]} : vector<8x96xf32> to vector<8x8xf32>
    %cst_26 = arith.constant dense<0.000000e+00> : vector<8x8xf32>
    %67 = tpu.matmul %64, %65, %cst_26 {dimension_numbers = #tpu.dot_dimension_numbers<[1], [1], [0], [0], [0, 0, 1, 0], [], []>} : vector<8x8xf32>, vector<8x8xf32>, vector<8x8xf32> -> vector<8x8xf32>
    %cst_27 = arith.constant 0.353553385 : f32
    %68 = vector.broadcast %cst_27 : f32 to vector<8x8xf32>
    %69 = arith.mulf %67, %68 : vector<8x8xf32>
    %70 = arith.addf %69, %6 : vector<8x8xf32>
    %cst_28 = arith.constant dense<0xFF800000> : vector<8xf32>
    %71 = vector.multi_reduction <maximumf>, %70, %cst_28 [1] : vector<8x8xf32> to vector<8xf32>
    %72 = vector.shape_cast %71 : vector<8xf32> to vector<8x1xf32>
    %73 = vector.broadcast %72 : vector<8x1xf32> to vector<8x8xf32>
    %74 = arith.subf %70, %73 : vector<8x8xf32>
    %75 = math.exp %74 : vector<8x8xf32>
    %cst_29 = arith.constant dense<0.000000e+00> : vector<8xf32>
    %76 = vector.multi_reduction <add>, %75, %cst_29 [1] : vector<8x8xf32> to vector<8xf32>
    %77 = vector.shape_cast %76 : vector<8xf32> to vector<8x1xf32>
    %78 = tpu.reciprocal %77 {approx = true} : vector<8x1xf32> -> vector<8x1xf32>
    %cst_30 = arith.constant dense<0.000000e+00> : vector<8x8xf32>
    %79 = tpu.matmul %75, %66, %cst_30 {dimension_numbers = #tpu.dot_dimension_numbers<[1], [0], [0], [1], [0, 0, 1, 1], [], []>} : vector<8x8xf32>, vector<8x8xf32>, vector<8x8xf32> -> vector<8x8xf32>
    %80 = vector.broadcast %78 : vector<8x1xf32> to vector<8x8xf32>
    %81 = arith.mulf %79, %80 : vector<8x8xf32>
    %c0_31 = arith.constant 0 : index
    %c24 = arith.constant 24 : index
    %82 = vector.load %arg18[%c0_31, %c24] : memref<8x32xf32, #tpu.memory_space<vmem>>, vector<8x8xf32>
    tpu.vector_store %arg18[%c0_31, %c24], %81 {strides = array<i32>} : memref<8x32xf32, #tpu.memory_space<vmem>>, vector<8x8xf32>,
    %c0_32 = arith.constant 0 : index
    %c0_33 = arith.constant 0 : index
    %83 = vector.load %arg18[%c0_32, %c0_33] : memref<8x32xf32, #tpu.memory_space<vmem>>, vector<8x32xf32>
    %c0_34 = arith.constant 0 : index
    %c0_35 = arith.constant 0 : index
    %84 = vector.load %arg5[%c0_34, %c0_35] : memref<32x32xf32, #tpu.memory_space<vmem>>, vector<32x32xf32>
    %cst_36 = arith.constant dense<0.000000e+00> : vector<8x32xf32>
    %85 = tpu.matmul %83, %84, %cst_36 {dimension_numbers = #tpu.dot_dimension_numbers<[1], [0], [0], [1], [0, 0, 1, 1], [], []>} : vector<8x32xf32>, vector<32x32xf32>, vector<8x32xf32> -> vector<8x32xf32>
    %c0_37 = arith.constant 0 : index
    %c0_38 = arith.constant 0 : index
    %86 = vector.load %arg6[%c0_37, %c0_38] : memref<1x32xf32, #tpu.memory_space<vmem>>, vector<1x32xf32>
    %87 = vector.broadcast %86 : vector<1x32xf32> to vector<8x32xf32>
    %88 = arith.addf %85, %87 : vector<8x32xf32>
    %89 = arith.addf %0, %88 : vector<8x32xf32>
    %c0_39 = arith.constant 0 : index
    %c0_40 = arith.constant 0 : index
    %90 = vector.load %arg11[%c0_39, %c0_40] : memref<1x32xf32, #tpu.memory_space<vmem>>, vector<1x32xf32>
    %c0_41 = arith.constant 0 : index
    %c0_42 = arith.constant 0 : index
    %91 = vector.load %arg12[%c0_41, %c0_42] : memref<1x32xf32, #tpu.memory_space<vmem>>, vector<1x32xf32>
    %cst_43 = arith.constant dense<0.000000e+00> : vector<8xf32>
    %92 = vector.multi_reduction <add>, %89, %cst_43 [1] : vector<8x32xf32> to vector<8xf32>
    %93 = vector.shape_cast %92 : vector<8xf32> to vector<8x1xf32>
    %cst_44 = arith.constant 3.200000e+01 : f32
    %94 = vector.broadcast %cst_44 : f32 to vector<8x1xf32>
    %95 = arith.divf %93, %94 : vector<8x1xf32>
    %96 = vector.broadcast %95 : vector<8x1xf32> to vector<8x32xf32>
    %97 = arith.subf %89, %96 : vector<8x32xf32>
    %98 = arith.mulf %97, %97 : vector<8x32xf32>
    %cst_45 = arith.constant dense<0.000000e+00> : vector<8xf32>
    %99 = vector.multi_reduction <add>, %98, %cst_45 [1] : vector<8x32xf32> to vector<8xf32>
    %100 = vector.shape_cast %99 : vector<8xf32> to vector<8x1xf32>
    %cst_46 = arith.constant 3.200000e+01 : f32
    %101 = vector.broadcast %cst_46 : f32 to vector<8x1xf32>
    %102 = arith.divf %100, %101 : vector<8x1xf32>
    %103 = vector.broadcast %95 : vector<8x1xf32> to vector<8x32xf32>
    %104 = arith.subf %89, %103 : vector<8x32xf32>
    %cst_47 = arith.constant 9.99999974E-6 : f32
    %105 = vector.broadcast %cst_47 : f32 to vector<8x1xf32>
    %106 = arith.addf %102, %105 : vector<8x1xf32>
    %107 = math.rsqrt %106 : vector<8x1xf32>
    %108 = vector.broadcast %107 : vector<8x1xf32> to vector<8x32xf32>
    %109 = arith.mulf %104, %108 : vector<8x32xf32>
    %110 = vector.broadcast %90 : vector<1x32xf32> to vector<8x32xf32>
    %111 = arith.mulf %109, %110 : vector<8x32xf32>
    %112 = vector.broadcast %91 : vector<1x32xf32> to vector<8x32xf32>
    %113 = arith.addf %111, %112 : vector<8x32xf32>
    %c0_48 = arith.constant 0 : index
    %c0_49 = arith.constant 0 : index
    %114 = vector.load %arg7[%c0_48, %c0_49] : memref<32x128xf32, #tpu.memory_space<vmem>>, vector<32x128xf32>
    %cst_50 = arith.constant dense<0.000000e+00> : vector<8x128xf32>
    %115 = tpu.matmul %113, %114, %cst_50 {dimension_numbers = #tpu.dot_dimension_numbers<[1], [0], [0], [1], [0, 0, 1, 1], [], []>} : vector<8x32xf32>, vector<32x128xf32>, vector<8x128xf32> -> vector<8x128xf32>
    %c0_51 = arith.constant 0 : index
    %c0_52 = arith.constant 0 : index
    %116 = vector.load %arg8[%c0_51, %c0_52] : memref<1x128xf32, #tpu.memory_space<vmem>>, vector<1x128xf32>
    %117 = vector.broadcast %116 : vector<1x128xf32> to vector<8x128xf32>
    %118 = arith.addf %115, %117 : vector<8x128xf32>
    %cst_53 = arith.constant 0.000000e+00 : f32
    %119 = vector.broadcast %cst_53 : f32 to vector<8x128xf32>
    %120 = arith.maximumf %118, %119 : vector<8x128xf32>
    %c0_54 = arith.constant 0 : index
    %c0_55 = arith.constant 0 : index
    %121 = vector.load %arg9[%c0_54, %c0_55] : memref<128x32xf32, #tpu.memory_space<vmem>>, vector<128x32xf32>
    %cst_56 = arith.constant dense<0.000000e+00> : vector<8x32xf32>
    %122 = tpu.matmul %120, %121, %cst_56 {dimension_numbers = #tpu.dot_dimension_numbers<[1], [0], [0], [1], [0, 0, 1, 1], [], []>} : vector<8x128xf32>, vector<128x32xf32>, vector<8x32xf32> -> vector<8x32xf32>
    %c0_57 = arith.constant 0 : index
    %c0_58 = arith.constant 0 : index
    %123 = vector.load %arg10[%c0_57, %c0_58] : memref<1x32xf32, #tpu.memory_space<vmem>>, vector<1x32xf32>
    %124 = vector.broadcast %123 : vector<1x32xf32> to vector<8x32xf32>
    %125 = arith.addf %122, %124 : vector<8x32xf32>
    %126 = arith.addf %113, %125 : vector<8x32xf32>
    %c0_59 = arith.constant 0 : index
    %c0_60 = arith.constant 0 : index
    %127 = vector.load %arg13[%c0_59, %c0_60] : memref<1x32xf32, #tpu.memory_space<vmem>>, vector<1x32xf32>
    %c0_61 = arith.constant 0 : index
    %c0_62 = arith.constant 0 : index
    %128 = vector.load %arg14[%c0_61, %c0_62] : memref<1x32xf32, #tpu.memory_space<vmem>>, vector<1x32xf32>
    %cst_63 = arith.constant dense<0.000000e+00> : vector<8xf32>
    %129 = vector.multi_reduction <add>, %126, %cst_63 [1] : vector<8x32xf32> to vector<8xf32>
    %130 = vector.shape_cast %129 : vector<8xf32> to vector<8x1xf32>
    %cst_64 = arith.constant 3.200000e+01 : f32
    %131 = vector.broadcast %cst_64 : f32 to vector<8x1xf32>
    %132 = arith.divf %130, %131 : vector<8x1xf32>
    %133 = vector.broadcast %132 : vector<8x1xf32> to vector<8x32xf32>
    %134 = arith.subf %126, %133 : vector<8x32xf32>
    %135 = arith.mulf %134, %134 : vector<8x32xf32>
    %cst_65 = arith.constant dense<0.000000e+00> : vector<8xf32>
    %136 = vector.multi_reduction <add>, %135, %cst_65 [1] : vector<8x32xf32> to vector<8xf32>
    %137 = vector.shape_cast %136 : vector<8xf32> to vector<8x1xf32>
    %cst_66 = arith.constant 3.200000e+01 : f32
    %138 = vector.broadcast %cst_66 : f32 to vector<8x1xf32>
    %139 = arith.divf %137, %138 : vector<8x1xf32>
    %140 = vector.broadcast %132 : vector<8x1xf32> to vector<8x32xf32>
    %141 = arith.subf %126, %140 : vector<8x32xf32>
    %cst_67 = arith.constant 9.99999974E-6 : f32
    %142 = vector.broadcast %cst_67 : f32 to vector<8x1xf32>
    %143 = arith.addf %139, %142 : vector<8x1xf32>
    %144 = math.rsqrt %143 : vector<8x1xf32>
    %145 = vector.broadcast %144 : vector<8x1xf32> to vector<8x32xf32>
    %146 = arith.mulf %141, %145 : vector<8x32xf32>
    %147 = vector.broadcast %127 : vector<1x32xf32> to vector<8x32xf32>
    %148 = arith.mulf %146, %147 : vector<8x32xf32>
    %149 = vector.broadcast %128 : vector<1x32xf32> to vector<8x32xf32>
    %150 = arith.addf %148, %149 : vector<8x32xf32>
    %c0_68 = arith.constant 0 : index
    %c0_69 = arith.constant 0 : index
    %151 = vector.load %arg17[%c0_68, %c0_69] : memref<8x32xf32, #tpu.memory_space<vmem>>, vector<8x32xf32>
    tpu.vector_store %arg17[%c0_68, %c0_69], %150 {strides = array<i32>} : memref<8x32xf32, #tpu.memory_space<vmem>>, vector<8x32xf32>,
    return
  }
  func.func @transform_0(%arg0: i32) -> (i32, i32) {
    %c0_i32 = arith.constant 0 : i32
    %c0_i32_0 = arith.constant 0 : i32
    return %arg0, %c0_i32 : i32, i32
  }
  func.func @transform_1(%arg0: i32) -> (i32, i32) {
    %c0_i32 = arith.constant 0 : i32
    %c0_i32_0 = arith.constant 0 : i32
    %c0_i32_1 = arith.constant 0 : i32
    return %c0_i32, %c0_i32_0 : i32, i32
  }
  func.func @transform_2(%arg0: i32) -> (i32, i32) {
    %c0_i32 = arith.constant 0 : i32
    %c0_i32_0 = arith.constant 0 : i32
    %c0_i32_1 = arith.constant 0 : i32
    return %c0_i32, %c0_i32_0 : i32, i32
  }
  func.func @transform_3(%arg0: i32) -> (i32, i32) {
    %c0_i32 = arith.constant 0 : i32
    %c0_i32_0 = arith.constant 0 : i32
    %c0_i32_1 = arith.constant 0 : i32
    return %c0_i32, %c0_i32_0 : i32, i32
  }
  func.func @transform_4(%arg0: i32) -> (i32, i32) {
    %c0_i32 = arith.constant 0 : i32
    %c0_i32_0 = arith.constant 0 : i32
    %c0_i32_1 = arith.constant 0 : i32
    return %c0_i32, %c0_i32_0 : i32, i32
  }
  func.func @transform_5(%arg0: i32) -> (i32, i32) {
    %c0_i32 = arith.constant 0 : i32
    %c0_i32_0 = arith.constant 0 : i32
    %c0_i32_1 = arith.constant 0 : i32
    return %c0_i32, %c0_i32_0 : i32, i32
  }
  func.func @transform_6(%arg0: i32) -> (i32, i32) {
    %c0_i32 = arith.constant 0 : i32
    %c0_i32_0 = arith.constant 0 : i32
    %c0_i32_1 = arith.constant 0 : i32
    return %c0_i32, %c0_i32_0 : i32, i32
  }
  func.func @transform_7(%arg0: i32) -> (i32, i32) {
    %c0_i32 = arith.constant 0 : i32
    %c0_i32_0 = arith.constant 0 : i32
    %c0_i32_1 = arith.constant 0 : i32
    return %c0_i32, %c0_i32_0 : i32, i32
  }
  func.func @transform_8(%arg0: i32) -> (i32, i32) {
    %c0_i32 = arith.constant 0 : i32
    %c0_i32_0 = arith.constant 0 : i32
    %c0_i32_1 = arith.constant 0 : i32
    return %c0_i32, %c0_i32_0 : i32, i32
  }
  func.func @transform_9(%arg0: i32) -> (i32, i32) {
    %c0_i32 = arith.constant 0 : i32
    %c0_i32_0 = arith.constant 0 : i32
    %c0_i32_1 = arith.constant 0 : i32
    return %c0_i32, %c0_i32_0 : i32, i32
  }
  func.func @transform_10(%arg0: i32) -> (i32, i32) {
    %c0_i32 = arith.constant 0 : i32
    %c0_i32_0 = arith.constant 0 : i32
    %c0_i32_1 = arith.constant 0 : i32
    return %c0_i32, %c0_i32_0 : i32, i32
  }
  func.func @transform_11(%arg0: i32) -> (i32, i32) {
    %c0_i32 = arith.constant 0 : i32
    %c0_i32_0 = arith.constant 0 : i32
    %c0_i32_1 = arith.constant 0 : i32
    return %c0_i32, %c0_i32_0 : i32, i32
  }
  func.func @transform_12(%arg0: i32) -> (i32, i32) {
    %c0_i32 = arith.constant 0 : i32
    %c0_i32_0 = arith.constant 0 : i32
    %c0_i32_1 = arith.constant 0 : i32
    return %c0_i32, %c0_i32_0 : i32, i32
  }
  func.func @transform_13(%arg0: i32) -> (i32, i32) {
    %c0_i32 = arith.constant 0 : i32
    %c0_i32_0 = arith.constant 0 : i32
    %c0_i32_1 = arith.constant 0 : i32
    return %c0_i32, %c0_i32_0 : i32, i32
  }
  func.func @transform_14(%arg0: i32) -> (i32, i32) {
    %c0_i32 = arith.constant 0 : i32
    %c0_i32_0 = arith.constant 0 : i32
    %c0_i32_1 = arith.constant 0 : i32
    return %c0_i32, %c0_i32_0 : i32, i32
  }
  func.func @transform_15(%arg0: i32) -> (i32, i32) {
    %c0_i32 = arith.constant 0 : i32
    %c0_i32_0 = arith.constant 0 : i32
    %c0_i32_1 = arith.constant 0 : i32
    return %c0_i32, %c0_i32_0 : i32, i32
  }
  func.func @transform_16(%arg0: i32) -> (i32, i32) {
    %c0_i32 = arith.constant 0 : i32
    %c0_i32_0 = arith.constant 0 : i32
    return %arg0, %c0_i32 : i32, i32
  }
}

</mosaic_0001>

<bundles_post_ra>
// kernel: eq.8
= control target key start
LH: loop header
LB: loop body
LE: loop exit
PB: predicated region body
PF: predicated region fallthrough
CT: control target
= control target key end

     0   :  { %vm7_vm0 = vcmask 15360   ;;  %s37_s8 = smov 2   ;;  %s38_s9 = smov 4   ;;  %vm13_vm1 = vcmask 64560   ;;  %vm19_vm2 = vcmask 48160   ;;  %vm25_vm3 = vcmask 31760   ;;  %s55_s0 = inlined_call_operand.vmem [shape: s32[4,2], index: 0, kind: input, shape index: {}]   ;;  %s56_s1 = inlined_call_operand.vmem [shape: s32[8], index: 1, kind: output, shape index: {}]  }
   0x1   :  { %v4_v0 = vld [vmem:[%s55_s0] sm:$0xf]  ;;  %s36_s0 = smov 6  }
   0x2   :  { %5 = vst [vmem:[#allocation1] sm:$0xf] %v4_v0 }
   0x9   :  { %v10_v1 = vld [vmem:[#allocation1 + $0x3] sm:$0x1]   ;;  %v22_v2 = vld [vmem:[#allocation1 + $0x1] sm:$0x1]   ;;  %v6_v3 = vld [vmem:[#allocation1] sm:$0x1]  }
   0xa   :  { %11 = vrot.lane.b32.xlu0 %v10_v1, %s36_s0  ;;  %23 = vrot.lane.b32.xlu1 %v22_v2, %s37_s8  ;;  %v16_v4 = vld [vmem:[#allocation1 + $0x2] sm:$0x1]   ;;  %8 = vst.msk [vmem:[#allocation0] sm:$0x1] %vm7_vm0, %v6_v3  }
   0xe   :  { %17 = vrot.lane.b32.xlu0 %v16_v4, %s38_s9 }
  0x7c   :  { %v12_v5 = vpop.permute.xlu0 %11   ;;  %v24_v6 = vpop.permute.xlu1 %23  }
  0x7d   :  { %14 = vst.msk [vmem:[#allocation0] sm:$0x1] %vm13_vm1, %v12_v5  }
  0x80   :  { %v18_v7 = vpop.permute.xlu0 %17  }
  0x81   :  { %20 = vst.msk [vmem:[#allocation0] sm:$0x1] %vm19_vm2, %v18_v7  }
  0x82   :  { %26 = vst.msk [vmem:[#allocation0] sm:$0x1] %vm25_vm3, %v24_v6  }
  0x89   :  { %v30_v8 = vld [vmem:[#allocation0] sm:$0x1] }
  0x8a   :  { %32 = vst [vmem:[%s56_s1] sm:$0x1] %v30_v8 }

// kernel: transformer_forward.5
= control target key start
LH: loop header
LB: loop body
LE: loop exit
PB: predicated region body
PF: predicated region fallthrough
CT: control target
= control target key end

     0   :  { %vm28_vm0 = vcmask 261120   ;;  %s240_s0 = inlined_call_operand.vmem [shape: f32[16,32], index: 0, kind: input, shape index: {}]   ;;  %s241_s1 = inlined_call_operand.vmem [shape: f32[32,64], index: 1, kind: input, shape index: {}]   ;;  %s242_s2 = inlined_call_operand.vmem [shape: f32[1,64], index: 2, kind: input, shape index: {}]   ;;  %s243_s3 = inlined_call_operand.hbm [shape: f32[16,64], index: 3, kind: output, shape index: {}]  }
   0x1   :  { %v17_v0 = vld [vmem:[%s241_s1] sm:$0xff]  ;;  %v18_v1 = vld [vmem:[%s241_s1 + $0x8] sm:$0xff]  ;;  %v19_v2 = vld [vmem:[%s241_s1 + $0x10] sm:$0xff] }
   0x2   :  { %v149_v3 = vpack.c.bf16 %v18_v1, %v17_v0  ;;  %v20_v4 = vld [vmem:[%s241_s1 + $0x18] sm:$0xff]  ;;  %v15_v5 = vld [vmem:[%s240_s0] sm:$0xff] }
   0x3   :  { %v153_v6 = vpack.c.bf16 %v20_v4, %v19_v2  ;;  %146 = vmatprep.mubr.msk.f32.mxu0 %vm28_vm0, %v15_v5 }
   0x4   :  { %8 = vsyncpa [#allocation3], 0  ;;  %150 = vmatprep.subr.bf16.mxu0 %v149_v3  ;;  %v16_v7 = vld [vmem:[%s240_s0 + $0x8] sm:$0xff]  ;;  %v129_v8 = vld [vmem:[%s242_s2] ss:$0 sm:$0xff]  ;;  %s184_s1 = smov [#allocation2]  }
   0x5   :  { %152 = vmatpush3.bf16.msra.mxu0 %v149_v3  ;;  %s118_s26 = sshll.u32 %s184_s1, 4  ;;  %vm110_vm1 = vcmask 523264   ;;  %s119_s26 = int_to_ptr.vmem [resolvable:$true] %s118_s26 }
   0x6   :  { %154 = vmatprep.subr.bf16.mxu0 %v153_v6  ;;  %s160_s27 = scalar_lea.vmem %s119_s26, 256  ;;  %p165_p1 = scmp.lt.s32.totalorder %s119_s26, %s119_s26 }
   0x7   :  { %p161_p0 = scmp.ne.s32.totalorder %s119_s26, %s160_s27  ;;  %p166_p2 = scmp.lt.s32.totalorder %s160_s27, %s160_s27 }
   0x9   :  { %156 = vmatpush3.bf16.msra.mxu0 %v153_v6  ;;  %p167_p3 = por %p166_p2, %p165_p1 }
   0xb   :  { %p168_p4 = pnand %p167_p3, %p161_p0 }
   0xc   :  { %147 = vmatmul.mubr.msk.f32.vlgmr.msra.gmra.mrb[0].mxu0 %vm28_vm0, %v16_v7 }
  0xdf   :  { %v148_v9 = vpop.f32.mrb[0].mxu0 }
  0xe0   :  { %v107_v10 = vadd.f32 %v148_v9, %v129_v8  ;;  %v101_v11 = vpop.f32.mrb[1].mxu0 }
  0xe1   :  { %v102_v12 = vadd.f32 %v129_v8, %v101_v11 }
  0xe2   :  { %112 = vst.msk [vmem:[#allocation2 + $0x8] sm:$0xff] %vm110_vm1, %v107_v10 }
  0xe3   :  { %111 = vst.msk [vmem:[#allocation2] sm:$0xff] %vm110_vm1, %v102_v12 }
  0xe4   :  { %171 = shalt.err (!%p168_p4)
}
  0xe5   :  { %s172_s2 = scalar_lea.hbm %s243_s3, 256 }
  0xe6   :  { %p173_p5 = scmp.ne.s32.totalorder %s243_s3, %s172_s2  ;;  %p176_p6 = scmp.lt.u32.totalorder %s172_s2, %s243_s3 }
  0xe8   :  { %p178_p7 = pnand %p176_p6, %p173_p5 }
  0xea   :  { %181 = shalt.err (!%p178_p7)
}
  0xeb   :  { %s185_s6 = smov 128   ;;  %s186_s7 = smov 8  }
  0xec   :  { %124 = dma.vmem_to_hbm [thread:$0]  %s119_s26, 256, %s243_s3, [#allocation3], %s185_s6, %s185_s6, %s186_s7  }
  0xed   :  { %182 = dma.done.wait [#allocation3], 256  }
  0xee   :  { %183 = vsyncadd [#allocation3], 4294967040 }
  0xef   :  { %128 = vsyncpa [#allocation3], 1 }

// kernel: transformer_forward.4
= control target key start
LH: loop header
LB: loop body
LE: loop exit
PB: predicated region body
PF: predicated region fallthrough
CT: control target
= control target key end

     0   :  { %s2087_s21 = smov 0   ;;  %s2323_s0 = inlined_call_operand.vmem [shape: f32[16,32], index: 0, kind: input, shape index: {}]   ;;  %s2324_s1 = inlined_call_operand.vmem [shape: f32[8,8], index: 1, kind: input, shape index: {}]   ;;  %s2325_s2 = inlined_call_operand.vmem [shape: f32[32,96], index: 2, kind: input, shape index: {}]   ;;  %s2326_s3 = inlined_call_operand.vmem [shape: f32[1,96], index: 3, kind: input, shape index: {}]   ;;  %s2327_s4 = inlined_call_operand.vmem [shape: f32[32,32], index: 4, kind: input, shape index: {}]   ;;  %s2328_s5 = inlined_call_operand.vmem [shape: f32[1,32], index: 5, kind: input, shape index: {}]   ;;  %s2329_s6 = inlined_call_operand.vmem [shape: f32[32,128], index: 6, kind: input, shape index: {}]   ;;  %s2330_s7 = inlined_call_operand.vmem [shape: f32[1,128], index: 7, kind: input, shape index: {}]   ;;  %s2331_s8 = inlined_call_operand.vmem [shape: f32[128,32], index: 8, kind: input, shape index: {}]   ;;  %s2332_s9 = inlined_call_operand.vmem [shape: f32[1,32], index: 9, kind: input, shape index: {}]   ;;  %s2333_s10 = inlined_call_operand.vmem [shape: f32[1,32], index: 10, kind: input, shape index: {}]   ;;  %s2334_s11 = inlined_call_operand.vmem [shape: f32[1,32], index: 11, kind: input, shape index: {}]   ;;  %s2335_s12 = inlined_call_operand.vmem [shape: f32[1,32], index: 12, kind: input, shape index: {}]   ;;  %s2336_s13 = inlined_call_operand.vmem [shape: f32[1,32], index: 13, kind: input, shape index: {}]   ;;  %s2337_s14 = inlined_call_operand.vmem [shape: f32[1,32], index: 14, kind: input, shape index: {}]   ;;  %s2338_s15 = inlined_call_operand.vmem [shape: f32[1,32], index: 15, kind: input, shape index: {}]   ;;  %s2339_s16 = inlined_call_operand.vmem [shape: f32[16,32], index: 16, kind: output, shape index: {}]  }
   0x1   :  { %2340 = sst [smem:[#allocation3_spill]] %s2323_s0 }
   0x2 LB: > { %s1698_s22 = sadd.s32 4294967295, %s1983_s21   ;;  %p1702_p0 = scmp.ge.s32.totalorder %s1983_s21, 1  ;;  %s1983_s21 = sphi %s2087_s21, %s26_s21  }
   0x3   : > { %p461_p1 = scmp.lt.s32.totalorder %s1983_s21, 3 }
   0x5   : > { %p462_p2 = pnand %p1702_p0, %p461_p1 }
   0x6   : > { %v518_v0 = vld [vmem:[%s2325_s2] sm:$0xff] (!%p462_p2)  ;;  %v519_v1 = vld [vmem:[%s2325_s2 + $0x8] sm:$0xff] (!%p462_p2)  ;;  %v520_v2 = vld [vmem:[%s2325_s2 + $0x10] sm:$0xff] (!%p462_p2)  ;;  %v1985_v3 = vmov (!%p462_p2), 0.0|0.0   ;;  %vm1986_vm0 = vmmov (!%p462_p2), 0   ;;  %v1987_v6 = vmov (!%p462_p2), 0.0  }
   0x7   : > { %465 = sbr.rel (%p462_p2) target bundleno = 2702 (0xa8e), region = 84  ;;  %1888 = vmatprep.subr.bf16.mxu1 (!%p462_p2), %v1985_v3  ;;  %v1889_v4 = vpack.c.bf16 (!%p462_p2), %v519_v1, %v518_v0  ;;  %v521_v5 = vld [vmem:[%s2325_s2 + $0x18] sm:$0xff] (!%p462_p2)  ;;  %1788 = vmatprep.mubr.msk.f32.mxu1 (!%p462_p2), %vm1986_vm0, %v1987_v6  ;;  %p509_p3 = scmp.lt.s32.totalorder (!%p462_p2), %s1698_s22, 1  ;;  %vm529_vm1 = vcmask (!%p462_p2), 261120   ;;  %v1705_v9 = vld [vmem:[%s2326_s3] ss:$0 sm:$0xff] (!%p462_p2) }
   0x8   : > { %1801 = vmatprep.subr.mxu0 (!%p462_p2), %v1987_v6  ;;  %1803 = vmatprep.mubr.msk.f32.mxu0 (!%p462_p2), %vm1986_vm0, %v1987_v6  ;;  %v1892_v7 = vpack.c.bf16 (!%p462_p2), %v521_v5, %v520_v2  ;;  %s2341_s19 = sld [smem:[#allocation3_spill]] (!%p462_p2)  ;;  %s1988_s25 = smov (!%p462_p2), 120   ;;  %vm607_vm2 = vcmask (!%p462_p2), 64512   ;;  %v603_v21 = vld [vmem:[%s2324_s1] sm:$0xff] (!%p462_p2)  ;;  %vm943_vm3 = vcmask (!%p462_p2), 130112   ;;  %vm1116_vm4 = vcmask (!%p462_p2), 195712  }
   0x9   : > { %1890 = vmatpush3.bf16.msra.mxu1 (!%p462_p2), %v1889_v4  ;;  %s1989_s26 = smov (!%p462_p2), 96   ;;  %s1990_s27 = smov (!%p462_p2), 80   ;;  %vm1289_vm5 = vcmask (!%p462_p2), 261312  }
   0xa   : > { %1891 = vmatprep.subr.bf16.mxu1 (!%p462_p2), %v1985_v3  ;;  %s1991_s28 = smov (!%p462_p2), 88   ;;  %s1992_s29 = smov (!%p462_p2), 72  }
   0xb   : > { %s1993_s30 = smov (!%p462_p2), 112   ;;  %s1994_s17 = smov (!%p462_p2), 104  }
   0xc   : > { %s1996_s23 = smov (!%p462_p2), 64   ;;  %s1997_s24 = smov (!%p462_p2), 40  }
   0xd   : > { %1893 = vmatpush3.bf16.msra.mxu1 (!%p462_p2), %v1892_v7 }
   0xe   : > { %s2343_s22 = smov (!%p509_p3, %s1698_s22), 1  ;;  %1791 = vmatprep.subr.mxu1 %v1987_v6 }
   0xf   : > { %s1703_s0 = sshll.u32 %s2343_s22, 3 }
  0x10   : > { %s512_s20 = scalar_lea.vmem %s2341_s19, %s1703_s0 }
  0x11   : > { %v2122_v8 = vld [vmem:[%s512_s20] sm:$0xff]  ;;  %s1995_s20 = smov 56  }
  0x12   : > { %1789 = vmatmul.mubr.msk.f32.vlgmr.msra.gmra.mrb[0].mxu1 %vm529_vm1, %v2122_v8 }
  0x13   : > { %1793 = vmatprep.mubr.msk.f32.mxu1 %vm1986_vm0, %v1987_v6 }
  0xe5   : > { %v599_v10 = vpop.f32.mrb[0].mxu1 }
  0xe6   : > { %v2132_v11 = vadd.f32 %v1705_v9, %v599_v10  ;;  %v1790_v12 = vpop.f32.mrb[1].mxu1 }
  0xe8   : > { %772 = vrot.lane.b32.xlu1 %v2132_v11, %s1988_s25  ;;  %605 = vrot.lane.b32.xlu0 %v2132_v11, %s1989_s26  ;;  %s1998_s25 = smov 48   ;;  %s1999_s26 = smov 8  }
  0xec   : > { %947 = vrot.lane.b32.xlu1 %v2132_v11, %s1990_s27  ;;  %774 = vrot.lane.b32.xlu0 %v2132_v11, %s1991_s28 }
  0xf0   : > { %1120 = vrot.lane.b32.xlu1 %v2132_v11, %s1992_s29  ;;  %945 = vrot.lane.b32.xlu0 %v2132_v11, %s1993_s30 }
  0xf4   : > { %1118 = vrot.lane.b32.xlu0 %v2132_v11, %s1994_s17 }
 0x15a   : > { %v773_v13 = vpop.permute.xlu1 %772  ;;  %v606_v14 = vpop.permute.xlu0 %605 }
 0x15b   : > { %1792 = vmatpush3.xpose.msk.msra.mxu1 %vm607_vm2, %v606_v14 }
 0x15c   : > { %1796 = vmatprep.subr.mxu1 %v1987_v6 }
 0x15e   : > { %1794 = vmatmul.mubr.msk.f32.vlgmr.msra.gmra.mrb[2].mxu1 %vm607_vm2, %v2132_v11  ;;  %v775_v15 = vpop.permute.xlu0 %774  ;;  %v948_v16 = vpop.permute.xlu1 %947 }
 0x15f   : > { %1802 = vmatpush3.xpose.msk.msra.mxu0 %vm607_vm2, %v775_v15  ;;  %1798 = vmatprep.mubr.msk.f32.mxu1 %vm1986_vm0, %v1987_v6 }
 0x160   : > { %1811 = vmatprep.subr.mxu0 %v1987_v6 }
 0x162   : > { %1804 = vmatmul.mubr.msk.f32.vlgmr.msra.gmra.mrb[0].mxu0 %vm607_vm2, %v773_v13  ;;  %v946_v17 = vpop.permute.xlu0 %945  ;;  %v1121_v18 = vpop.permute.xlu1 %1120 }
 0x163   : > { %1812 = vmatpush3.xpose.msk.msra.mxu0 %vm607_vm2, %v948_v16  ;;  %1813 = vmatprep.mubr.msk.f32.mxu0 %vm1986_vm0, %v1987_v6  ;;  %v1292_v16 = vld [vmem:[%s2327_s4] sm:$0xff] }
 0x164   : > { %1821 = vmatprep.subr.mxu0 %v1987_v6 }
 0x166   : > { %1814 = vmatmul.mubr.msk.f32.vlgmr.msra.gmra.mrb[2].mxu0 %vm607_vm2, %v946_v17  ;;  %v1119_v19 = vpop.permute.xlu0 %1118  ;;  %v1293_v17 = vld [vmem:[%s2327_s4 + $0x8] sm:$0xff] }
 0x167   : > { %1822 = vmatpush3.xpose.msk.msra.mxu0 %vm607_vm2, %v1121_v18  ;;  %1823 = vmatprep.mubr.msk.f32.mxu0 %vm1986_vm0, %v1987_v6 }
 0x168   : > { %1906 = vmatprep.subr.bf16.mxu0 %v1985_v3 }
 0x16a   : > { %1824 = vmatmul.mubr.msk.f32.vlgmr.msra.gmra.mrb[4].mxu0 %vm607_vm2, %v1119_v19 }
 0x16b   : > { %1885 = vmatprep.mubr.msk.f32.mxu0 %vm1986_vm0, %v1987_v6 }
 0x231   : > { %v678_v20 = vpop.f32.mrb[2].mxu1 }
 0x232   : > { %v682_v22 = vmul.f32 0.35355338, %v678_v20  ;;  %v1795_v23 = vpop.f32.mrb[3].mxu1  ;;  %v1895_v20 = vpack.c.bf16 %v1293_v17, %v1292_v16 }
 0x234   : > { %v683_v24 = vadd.f32 %v682_v22, %v603_v21  ;;  %v1295_v22 = vld [vmem:[%s2327_s4 + $0x18] sm:$0xff] }
 0x235   : > { %v846_v25 = vpop.f32.mrb[0].mxu0 }
 0x236   : > { %v850_v26 = vmul.f32 0.35355338, %v846_v25  ;;  %v1805_v27 = vpop.f32.mrb[1].mxu0  ;;  %v684_v28 = vsel %vm607_vm2, %v683_v24, -inf }
 0x237   : > { %685 = vmax.xlane.f32.xlu1 %v684_v28 }
 0x238   : > { %v851_v29 = vadd.f32 %v850_v26, %v603_v21 }
 0x239   : > { %v1019_v30 = vpop.f32.mrb[2].mxu0 }
 0x23a   : > { %v1023_v31 = vmul.f32 0.35355338, %v1019_v30  ;;  %v1815_v32 = vpop.f32.mrb[3].mxu0  ;;  %v852_v33 = vsel %vm607_vm2, %v851_v29, -inf }
 0x23b   : > { %853 = vmax.xlane.f32.xlu0 %v852_v33 }
 0x23c   : > { %v1024_v34 = vadd.f32 %v1023_v31, %v603_v21 }
 0x23d   : > { %v1192_v35 = vpop.f32.mrb[4].mxu0 }
 0x23e   : > { %v1825_v36 = vpop.f32.mrb[5].mxu0  ;;  %v1025_v37 = vsel %vm607_vm2, %v1024_v34, -inf  ;;  %v1196_v38 = vmul.f32 0.35355338, %v1192_v35 }
 0x23f   : > { %1026 = vmax.xlane.f32.xlu0 %v1025_v37 }
 0x240   : > { %v1197_v39 = vadd.f32 %v1196_v38, %v603_v21  ;;  %v1294_v21 = vld [vmem:[%s2327_s4 + $0x10] sm:$0xff] }
 0x241   : > { %v1898_v25 = vpack.c.bf16 %v1295_v22, %v1294_v21 }
 0x242   : > { %v1198_v40 = vsel %vm607_vm2, %v1197_v39, -inf }
 0x248   : > { %862 = vrot.lane.b32.xlu1 %v2132_v11, %s1995_s20 }
 0x255   : > { %694 = vrot.lane.b32.xlu0 %v2132_v11, %s1996_s23  ;;  %s2000_s23 = smov 16  }
 0x259   : > { %1208 = vrot.lane.b32.xlu0 %v2132_v11, %s1997_s24  ;;  %s2001_s24 = smov 24  }
 0x26c   : > { %1199 = vmax.xlane.f32.xlu1 %v1198_v40 }
 0x27d   : > { %1035 = vrot.lane.b32.xlu1 %v2132_v11, %s1998_s25  ;;  %s516_s25 = scalar_lea.vmem %s2339_s16, %s1703_s0 }
 0x2c4   : > { %v686_v41 = vpop.xlane.xlu1 %685 }
 0x2c5   : > { %v687_v42 = vsub.f32 %v683_v24, %v686_v41 }
 0x2c7   : > { %v688_v43 = vmul.f32 1.442695, %v687_v42 }
 0x2c8   : > { %v854_v44 = vpop.xlane.xlu0 %853  ;;  %v863_v52 = vpop.permute.xlu1 %862 }
 0x2c9   : > { %1955 = vpow2.f32 %v688_v43  ;;  %v855_v45 = vsub.f32 %v851_v29, %v854_v44 }
 0x2cb   : > { %v856_v46 = vmul.f32 1.442695, %v855_v45  ;;  %v1408_v45 = vld [vmem:[%s2329_s6 + $0x8] sm:$0xff] }
 0x2cc   : > { %v1027_v47 = vpop.xlane.xlu0 %1026 }
 0x2cd   : > { %1957 = vpow2.f32 %v856_v46  ;;  %v1028_v48 = vsub.f32 %v1024_v34, %v1027_v47  ;;  %v1719_v34 = vld [vmem:[%s2328_s5] ss:$0 sm:$0xff]  ;;  %v1410_v47 = vld [vmem:[%s2329_s6 + $0x18] sm:$0xff] }
 0x2cf   : > { %v1029_v49 = vmul.f32 1.442695, %v1028_v48 }
 0x2d0   : > { %v695_v50 = vpop.permute.xlu0 %694 }
 0x2d1   : > { %1959 = vpow2.f32 %v1029_v49  ;;  %1797 = vmatpush3.msra.mxu1 %v695_v50  ;;  %v1492_v49 = vld [vmem:[%s2331_s8] sm:$0xff]  ;;  %v1493_v50 = vld [vmem:[%s2331_s8 + $0x8] sm:$0xff] }
 0x2d2   : > { %1806 = vmatprep.subr.mxu1 %v1987_v6 }
 0x2d3   : > { %v1956_v51 = vpop.eup %1955 }
 0x2d4   : > { %1799 = vmatmul.mubr.msk.f32.vlgmr.msra.gmra.mrb[4].mxu1 %vm607_vm2, %v1956_v51  ;;  %v690_v57 = vsel %vm607_vm2, %v1956_v51, 0.0  ;;  %v1209_v62 = vpop.permute.xlu0 %1208  ;;  %v1494_v51 = vld [vmem:[%s2331_s8 + $0x10] sm:$0xff] }
 0x2d5   : > { %1807 = vmatpush3.msra.mxu1 %v863_v52  ;;  %1808 = vmatprep.mubr.msk.f32.mxu1 %vm1986_vm0, %v1987_v6  ;;  %v1907_v52 = vpack.c.bf16 %v1493_v50, %v1492_v49 }
 0x2d6   : > { %1816 = vmatprep.subr.mxu1 %v1987_v6 }
 0x2d7   : > { %v1958_v53 = vpop.eup %1957  ;;  %1908 = vmatpush3.bf16.msra.mxu0 %v1907_v52 }
 0x2d8   : > { %1809 = vmatmul.mubr.msk.f32.vlgmr.msra.gmra.mrb[6].mxu1 %vm607_vm2, %v1958_v53  ;;  %v858_v54 = vsel %vm607_vm2, %v1958_v53, 0.0  ;;  %v1495_v53 = vld [vmem:[%s2331_s8 + $0x18] sm:$0xff]  ;;  %1909 = vmatprep.subr.bf16.mxu0 %v1985_v3 }
 0x2d9   : > { %859 = vadd.xlane.f32.xlu1 %v858_v54  ;;  %1818 = vmatprep.mubr.msk.f32.mxu1 %vm1986_vm0, %v1987_v6  ;;  %v1910_v54 = vpack.c.bf16 %v1495_v53, %v1494_v51  ;;  %v1728_v53 = vld [vmem:[%s2337_s14] ss:$0 sm:$0xff] }
 0x2db   : > { %v1960_v55 = vpop.eup %1959  ;;  %1911 = vmatpush3.bf16.msra.mxu0 %v1910_v54 }
 0x2dc   : > { %v1031_v56 = vsel %vm607_vm2, %v1960_v55, 0.0  ;;  %1912 = vmatprep.subr.bf16.mxu0 %v1985_v3 }
 0x2dd   : > { %1032 = vadd.xlane.f32.xlu0 %v1031_v56  ;;  %691 = vadd.xlane.f32.xlu1 %v690_v57  ;;  %v1497_v56 = vld [vmem:[%s2331_s8 + $0x28] sm:$0xff] }
 0x2f9   : > { %v1200_v58 = vpop.xlane.xlu1 %1199 }
 0x2fa   : > { %v1201_v59 = vsub.f32 %v1197_v39, %v1200_v58  ;;  %v1498_v58 = vld [vmem:[%s2331_s8 + $0x30] sm:$0xff] }
 0x2fc   : > { %v1202_v60 = vmul.f32 1.442695, %v1201_v59  ;;  %v1499_v59 = vld [vmem:[%s2331_s8 + $0x38] sm:$0xff] }
 0x2fd   : > { %v1036_v61 = vpop.permute.xlu1 %1035 }
 0x2fe   : > { %1961 = vpow2.f32 %v1202_v60  ;;  %1817 = vmatpush3.msra.mxu1 %v1036_v61  ;;  %v1916_v60 = vpack.c.bf16 %v1499_v59, %v1498_v58  ;;  %v1500_v61 = vld [vmem:[%s2331_s8 + $0x40] sm:$0xff] }
 0x2ff   : > { %1819 = vmatmul.mubr.msk.f32.vlgmr.msra.gmra.mrb[8].mxu1 %vm607_vm2, %v1960_v55  ;;  %1826 = vmatprep.subr.mxu1 %v1987_v6  ;;  %v1496_v55 = vld [vmem:[%s2331_s8 + $0x20] sm:$0xff] }
 0x300   : > { %1827 = vmatpush3.msra.mxu1 %v1209_v62  ;;  %1828 = vmatprep.mubr.msk.f32.mxu1 %vm1986_vm0, %v1987_v6  ;;  %v1913_v57 = vpack.c.bf16 %v1497_v56, %v1496_v55  ;;  %v1501_v62 = vld [vmem:[%s2331_s8 + $0x48] sm:$0xff]  ;;  %v1729_v55 = vld [vmem:[%s2338_s15] ss:$0 sm:$0xff] }
 0x301   : > { %1894 = vmatprep.subr.bf16.mxu1 %v1985_v3 }
 0x302   : > { %1914 = vmatpush3.bf16.msra.mxu0 %v1913_v57 }
 0x303   : > { %1915 = vmatprep.subr.bf16.mxu0 %v1985_v3 }
 0x306   : > { %1917 = vmatpush3.bf16.msra.mxu0 %v1916_v60 }
 0x307   : > { %1918 = vmatprep.subr.bf16.mxu0 %v1985_v3 }
 0x308   : > { %v1962_v63 = vpop.eup %1961 }
 0x309   : > { %1829 = vmatmul.mubr.msk.f32.vlgmr.msra.gmra.mrb[10].mxu1 %vm607_vm2, %v1962_v63  ;;  %v1204_v0 = vsel %vm607_vm2, %v1962_v63, 0.0  ;;  %v1919_v63 = vpack.c.bf16 %v1501_v62, %v1500_v61 }
 0x30a   : > { %1205 = vadd.xlane.f32.xlu0 %v1204_v0  ;;  %1839 = vmatprep.mubr.msk.f32.mxu1 %vm1986_vm0, %v1987_v6  ;;  %v1502_v0 = vld [vmem:[%s2331_s8 + $0x50] sm:$0xff] }
 0x30b   : > { %1896 = vmatpush3.bf16.msra.mxu1 %v1895_v20  ;;  %1920 = vmatpush3.bf16.msra.mxu0 %v1919_v63  ;;  %v1723_v20 = vld [vmem:[%s2330_s7] ss:$0 sm:$0xff] }
 0x30c   : > { %1897 = vmatprep.subr.bf16.mxu1 %v1985_v3  ;;  %1921 = vmatprep.subr.bf16.mxu0 %v1985_v3 }
 0x30f   : > { %1899 = vmatpush3.bf16.msra.mxu1 %v1898_v25  ;;  %v1725_v25 = vld [vmem:[%s2332_s9] ss:$0 sm:$0xff] }
 0x310   : > { %1900 = vmatprep.subr.bf16.mxu1 %v1985_v3 }
 0x366   : > { %v860_v1 = vpop.xlane.xlu1 %859 }
 0x36a   : > { %v692_v2 = vpop.xlane.xlu1 %691  ;;  %v1033_v14 = vpop.xlane.xlu0 %1032 }
 0x36b   : > { %1963 = vrcp.f32 %v692_v2 }
 0x36c   : > { %1965 = vrcp.f32 %v860_v1  ;;  %v1503_v1 = vld [vmem:[%s2331_s8 + $0x58] sm:$0xff] }
 0x36d   : > { %1967 = vrcp.f32 %v1033_v14  ;;  %v1922_v2 = vpack.c.bf16 %v1503_v1, %v1502_v0 }
 0x36f   : > { %1923 = vmatpush3.bf16.msra.mxu0 %v1922_v2 }
 0x370   : > { %1924 = vmatprep.subr.bf16.mxu0 %v1985_v3 }
 0x375   : > { %v1964_v4 = vpop.eup %1963 }
 0x376   : > { %v1966_v10 = vpop.eup %1965 }
 0x377   : > { %v1968_v18 = vpop.eup %1967 }
 0x397   : > { %v1206_v15 = vpop.xlane.xlu0 %1205 }
 0x398   : > { %1969 = vrcp.f32 %v1206_v15  ;;  %v1722_v15 = vld [vmem:[%s2334_s11] ss:$0 sm:$0xff] }
 0x3a2   : > { %v1970_v26 = vpop.eup %1969 }
 0x3a7   : > { %v766_v5 = vpop.f32.mrb[4].mxu1 }
 0x3a8   : > { %v770_v7 = vmul.f32 %v1964_v4, %v766_v5  ;;  %v1800_v9 = vpop.f32.mrb[5].mxu1  ;;  %v1504_v4 = vld [vmem:[%s2331_s8 + $0x60] sm:$0xff]  ;;  %v1505_v5 = vld [vmem:[%s2331_s8 + $0x68] sm:$0xff] }
 0x3aa   : > { %771 = vst.msk [vmem:[#allocation2] sm:$0xff] %vm607_vm2, %v770_v7  ;;  %v1925_v7 = vpack.c.bf16 %v1505_v5, %v1504_v4 }
 0x3ab   : > { %v934_v11 = vpop.f32.mrb[6].mxu1 }
 0x3ac   : > { %v938_v12 = vmul.f32 %v1966_v10, %v934_v11  ;;  %v1810_v13 = vpop.f32.mrb[7].mxu1  ;;  %1926 = vmatpush3.bf16.msra.mxu0 %v1925_v7 }
 0x3ad   : > { %1927 = vmatprep.subr.bf16.mxu0 %v1985_v3  ;;  %v1721_v13 = vld [vmem:[%s2333_s10] ss:$0 sm:$0xff] }
 0x3ae   : > { %940 = vrot.lane.b32.xlu0 %v938_v12, %s1999_s26 }
 0x3d2   : > { %v1107_v19 = vpop.f32.mrb[8].mxu1 }
 0x3d3   : > { %v1111_v23 = vmul.f32 %v1968_v18, %v1107_v19  ;;  %v1820_v24 = vpop.f32.mrb[9].mxu1  ;;  %v1507_v18 = vld [vmem:[%s2331_s8 + $0x78] sm:$0xff] }
 0x3d5   : > { %1113 = vrot.lane.b32.xlu1 %v1111_v23, %s2000_s23 }
 0x3dc   : > { %v1280_v27 = vpop.f32.mrb[10].mxu1 }
 0x3dd   : > { %v1284_v28 = vmul.f32 %v1970_v26, %v1280_v27  ;;  %v1830_v29 = vpop.f32.mrb[11].mxu1 }
 0x3df   : > { %1286 = vrot.lane.b32.xlu1 %v1284_v28, %s2001_s24 }
 0x420   : > { %v941_v30 = vpop.permute.xlu0 %940 }
 0x421   : > { %944 = vst.msk [vmem:[#allocation2] sm:$0xff] %vm943_vm3, %v941_v30 }
 0x447   : > { %v1114_v31 = vpop.permute.xlu1 %1113 }
 0x448   : > { %1117 = vst.msk [vmem:[#allocation2] sm:$0xff] %vm1116_vm4, %v1114_v31 }
 0x451   : > { %v1287_v32 = vpop.permute.xlu1 %1286 }
 0x452   : > { %1290 = vst.msk [vmem:[#allocation2] sm:$0xff] %vm1289_vm5, %v1287_v32 }
 0x459   : > { %v1291_v33 = vld [vmem:[#allocation2] sm:$0xff] }
 0x45a   : > { %1840 = vmatmul.mubr.msk.f32.vlgmr.msra.gmra.mrb[12].mxu1 %vm529_vm1, %v1291_v33 }
 0x45b   : > { %1850 = vmatprep.mubr.msk.f32.mxu1 %vm1986_vm0, %v1987_v6  ;;  %v1407_v6 = vld [vmem:[%s2329_s6] sm:$0xff] }
 0x45c   : > { %v1901_v46 = vpack.c.bf16 %v1408_v45, %v1407_v6 }
 0x45e   : > { %1902 = vmatpush3.bf16.msra.mxu1 %v1901_v46 }
 0x45f   : > { %1903 = vmatprep.subr.bf16.mxu1 %v1985_v3  ;;  %v1506_v3 = vld [vmem:[%s2331_s8 + $0x70] sm:$0xff] }
 0x460   : > { %v1928_v19 = vpack.c.bf16 %v1507_v18, %v1506_v3 }
 0x462   : > { %1929 = vmatpush3.bf16.msra.mxu0 %v1928_v19 }
 0x52d   : > { %v1372_v35 = vpop.f32.mrb[12].mxu1 }
 0x52e   : > { %v1373_v36 = vadd.f32 %v1719_v34, %v1372_v35  ;;  %v1841_v37 = vpop.f32.mrb[13].mxu1 }
 0x530   : > { %v1376_v38 = vadd.f32 %v1373_v36, %v2122_v8  ;;  %v1409_v8 = vld [vmem:[%s2329_s6 + $0x10] sm:$0xff] }
 0x531   : > { %v1904_v48 = vpack.c.bf16 %v1410_v47, %v1409_v8 }
 0x532   : > { %v1379_v39 = vsel %vm529_vm1, %v1376_v38, 0.0 }
 0x533   : > { %1380 = vadd.xlane.f32.xlu0 %v1379_v39  ;;  %1905 = vmatpush3.bf16.msra.mxu1 %v1904_v48 }
 0x5c0   : > { %v1381_v40 = vpop.xlane.xlu0 %1380 }
 0x5c1   : > { %v1383_v41 = vmul.f32 0.03125, %v1381_v40  ;;  %v1726_v40 = vld [vmem:[%s2335_s12] ss:$0 sm:$0xff] }
 0x5c3   : > { %v1384_v42 = vsub.f32 %v1376_v38, %v1383_v41 }
 0x5c5   : > { %v1385_v43 = vmul.f32 %v1384_v42, %v1384_v42 }
 0x5c7   : > { %v1386_v44 = vsel %vm529_vm1, %v1385_v43, 0.0 }
 0x5c8   : > { %1387 = vadd.xlane.f32.xlu1 %v1386_v44 }
 0x655   : > { %v1388_v9 = vpop.xlane.xlu1 %1387 }
 0x656   : > { %v1389_v10 = vmul.f32 0.03125, %v1388_v9 }
 0x658   : > { %v1390_v11 = vadd.f32 1e-05, %v1389_v10 }
 0x65a   : > { %1971 = vrsqrt.f32 %v1390_v11 }
 0x664   : > { %v1972_v12 = vpop.eup %1971 }
 0x665   : > { %v1392_v14 = vmul.f32 %v1972_v12, %v1384_v42  ;;  %v1727_v42 = vld [vmem:[%s2336_s13] ss:$0 sm:$0xff] }
 0x667   : > { %v1399_v16 = vmul.f32 %v1721_v13, %v1392_v14 }
 0x669   : > { %v1406_v17 = vadd.f32 %v1722_v15, %v1399_v16 }
 0x66b   : > { %1851 = vmatmul.mubr.msk.f32.vlgmr.msra.gmra.mrb[14].mxu1 %vm529_vm1, %v1406_v17 }
 0x73e   : > { %v1487_v21 = vpop.f32.mrb[14].mxu1 }
 0x73f   : > { %v1488_v22 = vadd.f32 %v1723_v20, %v1487_v21  ;;  %v1852_v23 = vpop.f32.mrb[15].mxu1 }
 0x741   : > { %v1491_v24 = vmax.f32 %v1488_v22, 0.0 }
 0x743   : > { %1886 = vmatmul.mubr.f32.vlgmr.msra.gmra.mrb[6].mxu0 %v1491_v24 }
 0x816   : > { %v1581_v26 = vpop.f32.mrb[6].mxu0 }
 0x817   : > { %v1582_v27 = vadd.f32 %v1725_v25, %v1581_v26  ;;  %v1887_v28 = vpop.f32.mrb[7].mxu0 }
 0x819   : > { %v1585_v29 = vadd.f32 %v1582_v27, %v1406_v17 }
 0x81b   : > { %v1588_v30 = vsel %vm529_vm1, %v1585_v29, 0.0 }
 0x81c   : > { %1589 = vadd.xlane.f32.xlu0 %v1588_v30 }
 0x8a9   : > { %v1590_v31 = vpop.xlane.xlu0 %1589 }
 0x8aa   : > { %v1591_v32 = vmul.f32 0.03125, %v1590_v31 }
 0x8ac   : > { %v1592_v33 = vsub.f32 %v1585_v29, %v1591_v32 }
 0x8ae   : > { %v1593_v34 = vmul.f32 %v1592_v33, %v1592_v33 }
 0x8b0   : > { %v1594_v35 = vsel %vm529_vm1, %v1593_v34, 0.0 }
 0x8b1   : > { %1595 = vadd.xlane.f32.xlu0 %v1594_v35 }
 0x93e   : > { %v1596_v36 = vpop.xlane.xlu0 %1595 }
 0x93f   : > { %v1597_v37 = vmul.f32 0.03125, %v1596_v36 }
 0x941   : > { %v1598_v38 = vadd.f32 1e-05, %v1597_v37 }
 0x943   : > { %1973 = vrsqrt.f32 %v1598_v38 }
 0x94d   : > { %v1974_v39 = vpop.eup %1973 }
 0x94e   : > { %v1600_v41 = vmul.f32 %v1974_v39, %v1592_v33 }
 0x950   : > { %v1607_v43 = vmul.f32 %v1726_v40, %v1600_v41 }
 0x952   : > { %v1614_v44 = vadd.f32 %v1727_v42, %v1607_v43 }
 0x954   : > { %v1617_v6 = vsel %vm529_vm1, %v1614_v44, 0.0 }
 0x955   : > { %1618 = vadd.xlane.f32.xlu1 %v1617_v6 }
 0x9e2   : > { %v1619_v45 = vpop.xlane.xlu1 %1618 }
 0x9e3   : > { %v1620_v46 = vmul.f32 0.03125, %v1619_v45 }
 0x9e5   : > { %v1621_v8 = vsub.f32 %v1614_v44, %v1620_v46 }
 0x9e7   : > { %v1622_v47 = vmul.f32 %v1621_v8, %v1621_v8 }
 0x9e9   : > { %v1623_v48 = vsel %vm529_vm1, %v1622_v47, 0.0 }
 0x9ea   : > { %1624 = vadd.xlane.f32.xlu0 %v1623_v48 }
 0xa77   : > { %v1625_v49 = vpop.xlane.xlu0 %1624 }
 0xa78   : > { %v1626_v50 = vmul.f32 0.03125, %v1625_v49 }
 0xa7a   : > { %v1627_v51 = vadd.f32 1e-05, %v1626_v50 }
 0xa7c   : > { %1975 = vrsqrt.f32 %v1627_v51 }
 0xa86   : > { %v1976_v52 = vpop.eup %1975 }
 0xa87   : > { %v1629_v54 = vmul.f32 %v1976_v52, %v1621_v8 }
 0xa89   : > { %v1636_v56 = vmul.f32 %v1728_v53, %v1629_v54 }
 0xa8b   : > { %v1643_v57 = vadd.f32 %v1729_v55, %v1636_v56 }
 0xa8d   : > { %1644 = vst.msk [vmem:[%s516_s25] sm:$0xff] %vm529_vm1, %v1643_v57 }
 0xa8e PF: > { %s26_s21 = sadd.s32 1, %s1983_s21  }
 0xa8f   : > { %p23_p4 = scmp.ge.s32.totalorder %s26_s21, 4  }
 0xa91   :  { %25 = sbr.rel (!%p23_p4) target bundleno = 2 (0x2), region = 114 }

// kernel: transformer_forward.3
= control target key start
LH: loop header
LB: loop body
LE: loop exit
PB: predicated region body
PF: predicated region fallthrough
CT: control target
= control target key end

     0   :  { %s2054_s21 = smov 0   ;;  %s2282_s0 = inlined_call_operand.vmem [shape: f32[16,32], index: 0, kind: input, shape index: {}]   ;;  %s2283_s1 = inlined_call_operand.vmem [shape: f32[8,8], index: 1, kind: input, shape index: {}]   ;;  %s2284_s2 = inlined_call_operand.vmem [shape: f32[32,96], index: 2, kind: input, shape index: {}]   ;;  %s2285_s3 = inlined_call_operand.vmem [shape: f32[1,96], index: 3, kind: input, shape index: {}]   ;;  %s2286_s4 = inlined_call_operand.vmem [shape: f32[32,32], index: 4, kind: input, shape index: {}]   ;;  %s2287_s5 = inlined_call_operand.vmem [shape: f32[1,32], index: 5, kind: input, shape index: {}]   ;;  %s2288_s6 = inlined_call_operand.vmem [shape: f32[32,128], index: 6, kind: input, shape index: {}]   ;;  %s2289_s7 = inlined_call_operand.vmem [shape: f32[1,128], index: 7, kind: input, shape index: {}]   ;;  %s2290_s8 = inlined_call_operand.vmem [shape: f32[128,32], index: 8, kind: input, shape index: {}]   ;;  %s2291_s9 = inlined_call_operand.vmem [shape: f32[1,32], index: 9, kind: input, shape index: {}]   ;;  %s2292_s10 = inlined_call_operand.vmem [shape: f32[1,32], index: 10, kind: input, shape index: {}]   ;;  %s2293_s11 = inlined_call_operand.vmem [shape: f32[1,32], index: 11, kind: input, shape index: {}]   ;;  %s2294_s12 = inlined_call_operand.vmem [shape: f32[1,32], index: 12, kind: input, shape index: {}]   ;;  %s2295_s13 = inlined_call_operand.vmem [shape: f32[1,32], index: 13, kind: input, shape index: {}]   ;;  %s2296_s14 = inlined_call_operand.vmem [shape: f32[1,32], index: 14, kind: input, shape index: {}]   ;;  %s2297_s15 = inlined_call_operand.vmem [shape: f32[1,32], index: 15, kind: input, shape index: {}]   ;;  %s2298_s16 = inlined_call_operand.vmem [shape: f32[16,32], index: 16, kind: output, shape index: {}]  }
   0x1   :  { %2299 = sst [smem:[#allocation3_spill]] %s2282_s0 }
   0x2 LB: > { %s1669_s22 = sadd.s32 4294967295, %s1950_s21   ;;  %p1673_p0 = scmp.ge.s32.totalorder %s1950_s21, 1  ;;  %s1950_s21 = sphi %s2054_s21, %s26_s21  }
   0x3   : > { %p461_p1 = scmp.lt.s32.totalorder %s1950_s21, 3 }
   0x5   : > { %p462_p2 = pnand %p1673_p0, %p461_p1 }
   0x6   : > { %v518_v0 = vld [vmem:[%s2284_s2] sm:$0xff] (!%p462_p2)  ;;  %v519_v1 = vld [vmem:[%s2284_s2 + $0x8] sm:$0xff] (!%p462_p2)  ;;  %v520_v2 = vld [vmem:[%s2284_s2 + $0x10] sm:$0xff] (!%p462_p2)  ;;  %v1952_v3 = vmov (!%p462_p2), 0.0|0.0   ;;  %vm1953_vm0 = vmmov (!%p462_p2), 0   ;;  %v1954_v6 = vmov (!%p462_p2), 0.0  }
   0x7   : > { %465 = sbr.rel (%p462_p2) target bundleno = 2389 (0x955), region = 84  ;;  %1857 = vmatprep.subr.bf16.mxu1 (!%p462_p2), %v1952_v3  ;;  %v1858_v4 = vpack.c.bf16 (!%p462_p2), %v519_v1, %v518_v0  ;;  %v521_v5 = vld [vmem:[%s2284_s2 + $0x18] sm:$0xff] (!%p462_p2)  ;;  %1757 = vmatprep.mubr.msk.f32.mxu1 (!%p462_p2), %vm1953_vm0, %v1954_v6  ;;  %p509_p3 = scmp.lt.s32.totalorder (!%p462_p2), %s1669_s22, 1  ;;  %vm529_vm1 = vcmask (!%p462_p2), 261120   ;;  %v1676_v9 = vld [vmem:[%s2285_s3] ss:$0 sm:$0xff] (!%p462_p2) }
   0x8   : > { %1770 = vmatprep.subr.mxu0 (!%p462_p2), %v1954_v6  ;;  %1772 = vmatprep.mubr.msk.f32.mxu0 (!%p462_p2), %vm1953_vm0, %v1954_v6  ;;  %v1861_v7 = vpack.c.bf16 (!%p462_p2), %v521_v5, %v520_v2  ;;  %s2300_s17 = sld [smem:[#allocation3_spill]] (!%p462_p2)  ;;  %s1955_s14 = smov (!%p462_p2), 120   ;;  %vm607_vm2 = vcmask (!%p462_p2), 64512   ;;  %v603_v21 = vld [vmem:[%s2283_s1] sm:$0xff] (!%p462_p2)  ;;  %vm943_vm3 = vcmask (!%p462_p2), 130112   ;;  %vm1116_vm4 = vcmask (!%p462_p2), 195712  }
   0x9   : > { %1859 = vmatpush3.bf16.msra.mxu1 (!%p462_p2), %v1858_v4  ;;  %s1956_s15 = smov (!%p462_p2), 96   ;;  %s1957_s23 = smov (!%p462_p2), 80   ;;  %vm1289_vm5 = vcmask (!%p462_p2), 261312  }
   0xa   : > { %1860 = vmatprep.subr.bf16.mxu1 (!%p462_p2), %v1952_v3  ;;  %s1958_s24 = smov (!%p462_p2), 88   ;;  %s1959_s25 = smov (!%p462_p2), 72  }
   0xb   : > { %s1960_s26 = smov (!%p462_p2), 112   ;;  %s1961_s27 = smov (!%p462_p2), 104  }
   0xc   : > { %s1962_s0 = smov (!%p462_p2), 56   ;;  %s1965_s19 = smov (!%p462_p2), 48  }
   0xd   : > { %1862 = vmatpush3.bf16.msra.mxu1 (!%p462_p2), %v1861_v7  ;;  %s1966_s20 = smov (!%p462_p2), 8   ;;  %s1967_s30 = smov (!%p462_p2), 16  }
   0xe   : > { %s2302_s22 = smov (!%p509_p3, %s1669_s22), 1  ;;  %1760 = vmatprep.subr.mxu1 %v1954_v6 }
   0xf   : > { %s1674_s29 = sshll.u32 %s2302_s22, 3 }
  0x10   : > { %s512_s18 = scalar_lea.vmem %s2300_s17, %s1674_s29  ;;  %s1963_s17 = smov 64  }
  0x11   : > { %v2089_v8 = vld [vmem:[%s512_s18] sm:$0xff]  ;;  %s1964_s18 = smov 40  }
  0x12   : > { %1758 = vmatmul.mubr.msk.f32.vlgmr.msra.gmra.mrb[0].mxu1 %vm529_vm1, %v2089_v8 }
  0x13   : > { %1762 = vmatprep.mubr.msk.f32.mxu1 %vm1953_vm0, %v1954_v6 }
  0xe5   : > { %v599_v10 = vpop.f32.mrb[0].mxu1 }
  0xe6   : > { %v2099_v11 = vadd.f32 %v1676_v9, %v599_v10  ;;  %v1759_v12 = vpop.f32.mrb[1].mxu1 }
  0xe8   : > { %772 = vrot.lane.b32.xlu1 %v2099_v11, %s1955_s14  ;;  %605 = vrot.lane.b32.xlu0 %v2099_v11, %s1956_s15 }
  0xec   : > { %947 = vrot.lane.b32.xlu1 %v2099_v11, %s1957_s23  ;;  %774 = vrot.lane.b32.xlu0 %v2099_v11, %s1958_s24 }
  0xf0   : > { %1120 = vrot.lane.b32.xlu1 %v2099_v11, %s1959_s25  ;;  %945 = vrot.lane.b32.xlu0 %v2099_v11, %s1960_s26 }
  0xf4   : > { %1118 = vrot.lane.b32.xlu0 %v2099_v11, %s1961_s27 }
 0x15a   : > { %v773_v13 = vpop.permute.xlu1 %772  ;;  %v606_v14 = vpop.permute.xlu0 %605 }
 0x15b   : > { %1761 = vmatpush3.xpose.msk.msra.mxu1 %vm607_vm2, %v606_v14 }
 0x15c   : > { %1765 = vmatprep.subr.mxu1 %v1954_v6 }
 0x15e   : > { %1763 = vmatmul.mubr.msk.f32.vlgmr.msra.gmra.mrb[2].mxu1 %vm607_vm2, %v2099_v11  ;;  %v775_v15 = vpop.permute.xlu0 %774  ;;  %v948_v16 = vpop.permute.xlu1 %947 }
 0x15f   : > { %1771 = vmatpush3.xpose.msk.msra.mxu0 %vm607_vm2, %v775_v15  ;;  %1767 = vmatprep.mubr.msk.f32.mxu1 %vm1953_vm0, %v1954_v6 }
 0x160   : > { %1780 = vmatprep.subr.mxu0 %v1954_v6 }
 0x162   : > { %1773 = vmatmul.mubr.msk.f32.vlgmr.msra.gmra.mrb[0].mxu0 %vm607_vm2, %v773_v13  ;;  %v946_v17 = vpop.permute.xlu0 %945  ;;  %v1121_v18 = vpop.permute.xlu1 %1120 }
 0x163   : > { %1781 = vmatpush3.xpose.msk.msra.mxu0 %vm607_vm2, %v948_v16  ;;  %1782 = vmatprep.mubr.msk.f32.mxu0 %vm1953_vm0, %v1954_v6  ;;  %v1292_v16 = vld [vmem:[%s2286_s4] sm:$0xff] }
 0x164   : > { %1790 = vmatprep.subr.mxu0 %v1954_v6 }
 0x166   : > { %1783 = vmatmul.mubr.msk.f32.vlgmr.msra.gmra.mrb[2].mxu0 %vm607_vm2, %v946_v17  ;;  %v1119_v19 = vpop.permute.xlu0 %1118  ;;  %v1293_v17 = vld [vmem:[%s2286_s4 + $0x8] sm:$0xff] }
 0x167   : > { %1791 = vmatpush3.xpose.msk.msra.mxu0 %vm607_vm2, %v1121_v18  ;;  %1792 = vmatprep.mubr.msk.f32.mxu0 %vm1953_vm0, %v1954_v6 }
 0x168   : > { %1875 = vmatprep.subr.bf16.mxu0 %v1952_v3 }
 0x16a   : > { %1793 = vmatmul.mubr.msk.f32.vlgmr.msra.gmra.mrb[4].mxu0 %vm607_vm2, %v1119_v19 }
 0x16b   : > { %1854 = vmatprep.mubr.msk.f32.mxu0 %vm1953_vm0, %v1954_v6 }
 0x231   : > { %v678_v20 = vpop.f32.mrb[2].mxu1 }
 0x232   : > { %v682_v22 = vmul.f32 0.35355338, %v678_v20  ;;  %v1764_v23 = vpop.f32.mrb[3].mxu1  ;;  %v1864_v20 = vpack.c.bf16 %v1293_v17, %v1292_v16 }
 0x234   : > { %v683_v24 = vadd.f32 %v682_v22, %v603_v21  ;;  %v1295_v22 = vld [vmem:[%s2286_s4 + $0x18] sm:$0xff] }
 0x235   : > { %v846_v25 = vpop.f32.mrb[0].mxu0 }
 0x236   : > { %v850_v26 = vmul.f32 0.35355338, %v846_v25  ;;  %v1774_v27 = vpop.f32.mrb[1].mxu0  ;;  %v684_v28 = vsel %vm607_vm2, %v683_v24, -inf }
 0x237   : > { %685 = vmax.xlane.f32.xlu1 %v684_v28 }
 0x238   : > { %v851_v29 = vadd.f32 %v850_v26, %v603_v21 }
 0x239   : > { %v1019_v30 = vpop.f32.mrb[2].mxu0 }
 0x23a   : > { %v1023_v31 = vmul.f32 0.35355338, %v1019_v30  ;;  %v1784_v32 = vpop.f32.mrb[3].mxu0  ;;  %v852_v33 = vsel %vm607_vm2, %v851_v29, -inf }
 0x23b   : > { %853 = vmax.xlane.f32.xlu0 %v852_v33 }
 0x23c   : > { %v1024_v34 = vadd.f32 %v1023_v31, %v603_v21 }
 0x23d   : > { %v1192_v35 = vpop.f32.mrb[4].mxu0 }
 0x23e   : > { %v1794_v36 = vpop.f32.mrb[5].mxu0  ;;  %v1025_v37 = vsel %vm607_vm2, %v1024_v34, -inf  ;;  %v1196_v38 = vmul.f32 0.35355338, %v1192_v35 }
 0x23f   : > { %1026 = vmax.xlane.f32.xlu0 %v1025_v37 }
 0x240   : > { %v1197_v39 = vadd.f32 %v1196_v38, %v603_v21  ;;  %v1294_v21 = vld [vmem:[%s2286_s4 + $0x10] sm:$0xff] }
 0x241   : > { %v1867_v25 = vpack.c.bf16 %v1295_v22, %v1294_v21 }
 0x242   : > { %v1198_v40 = vsel %vm607_vm2, %v1197_v39, -inf }
 0x248   : > { %862 = vrot.lane.b32.xlu1 %v2099_v11, %s1962_s0  ;;  %s1968_s0 = smov 24  }
 0x255   : > { %694 = vrot.lane.b32.xlu0 %v2099_v11, %s1963_s17  ;;  %s516_s17 = scalar_lea.vmem %s2298_s16, %s1674_s29 }
 0x259   : > { %1208 = vrot.lane.b32.xlu0 %v2099_v11, %s1964_s18 }
 0x26c   : > { %1199 = vmax.xlane.f32.xlu1 %v1198_v40 }
 0x27d   : > { %1035 = vrot.lane.b32.xlu1 %v2099_v11, %s1965_s19 }
 0x2c4   : > { %v686_v41 = vpop.xlane.xlu1 %685 }
 0x2c5   : > { %v687_v42 = vsub.f32 %v683_v24, %v686_v41 }
 0x2c7   : > { %v688_v43 = vmul.f32 1.442695, %v687_v42 }
 0x2c8   : > { %v854_v44 = vpop.xlane.xlu0 %853  ;;  %v863_v52 = vpop.permute.xlu1 %862 }
 0x2c9   : > { %1924 = vpow2.f32 %v688_v43  ;;  %v855_v45 = vsub.f32 %v851_v29, %v854_v44 }
 0x2cb   : > { %v856_v46 = vmul.f32 1.442695, %v855_v45  ;;  %v1408_v45 = vld [vmem:[%s2288_s6 + $0x8] sm:$0xff] }
 0x2cc   : > { %v1027_v47 = vpop.xlane.xlu0 %1026 }
 0x2cd   : > { %1926 = vpow2.f32 %v856_v46  ;;  %v1028_v48 = vsub.f32 %v1024_v34, %v1027_v47  ;;  %v1690_v34 = vld [vmem:[%s2287_s5] ss:$0 sm:$0xff]  ;;  %v1410_v47 = vld [vmem:[%s2288_s6 + $0x18] sm:$0xff] }
 0x2cf   : > { %v1029_v49 = vmul.f32 1.442695, %v1028_v48 }
 0x2d0   : > { %v695_v50 = vpop.permute.xlu0 %694 }
 0x2d1   : > { %1928 = vpow2.f32 %v1029_v49  ;;  %1766 = vmatpush3.msra.mxu1 %v695_v50  ;;  %v1492_v49 = vld [vmem:[%s2290_s8] sm:$0xff]  ;;  %v1493_v50 = vld [vmem:[%s2290_s8 + $0x8] sm:$0xff] }
 0x2d2   : > { %1775 = vmatprep.subr.mxu1 %v1954_v6 }
 0x2d3   : > { %v1925_v51 = vpop.eup %1924 }
 0x2d4   : > { %1768 = vmatmul.mubr.msk.f32.vlgmr.msra.gmra.mrb[4].mxu1 %vm607_vm2, %v1925_v51  ;;  %v690_v57 = vsel %vm607_vm2, %v1925_v51, 0.0  ;;  %v1209_v62 = vpop.permute.xlu0 %1208  ;;  %v1494_v51 = vld [vmem:[%s2290_s8 + $0x10] sm:$0xff] }
 0x2d5   : > { %1776 = vmatpush3.msra.mxu1 %v863_v52  ;;  %1777 = vmatprep.mubr.msk.f32.mxu1 %vm1953_vm0, %v1954_v6  ;;  %v1876_v52 = vpack.c.bf16 %v1493_v50, %v1492_v49 }
 0x2d6   : > { %1785 = vmatprep.subr.mxu1 %v1954_v6 }
 0x2d7   : > { %v1927_v53 = vpop.eup %1926  ;;  %1877 = vmatpush3.bf16.msra.mxu0 %v1876_v52 }
 0x2d8   : > { %1778 = vmatmul.mubr.msk.f32.vlgmr.msra.gmra.mrb[6].mxu1 %vm607_vm2, %v1927_v53  ;;  %v858_v54 = vsel %vm607_vm2, %v1927_v53, 0.0  ;;  %v1495_v53 = vld [vmem:[%s2290_s8 + $0x18] sm:$0xff]  ;;  %1878 = vmatprep.subr.bf16.mxu0 %v1952_v3 }
 0x2d9   : > { %859 = vadd.xlane.f32.xlu1 %v858_v54  ;;  %1787 = vmatprep.mubr.msk.f32.mxu1 %vm1953_vm0, %v1954_v6  ;;  %v1879_v54 = vpack.c.bf16 %v1495_v53, %v1494_v51 }
 0x2db   : > { %v1929_v55 = vpop.eup %1928  ;;  %1880 = vmatpush3.bf16.msra.mxu0 %v1879_v54 }
 0x2dc   : > { %v1031_v56 = vsel %vm607_vm2, %v1929_v55, 0.0  ;;  %1881 = vmatprep.subr.bf16.mxu0 %v1952_v3 }
 0x2dd   : > { %1032 = vadd.xlane.f32.xlu0 %v1031_v56  ;;  %691 = vadd.xlane.f32.xlu1 %v690_v57  ;;  %v1497_v56 = vld [vmem:[%s2290_s8 + $0x28] sm:$0xff] }
 0x2f9   : > { %v1200_v58 = vpop.xlane.xlu1 %1199 }
 0x2fa   : > { %v1201_v59 = vsub.f32 %v1197_v39, %v1200_v58  ;;  %v1498_v58 = vld [vmem:[%s2290_s8 + $0x30] sm:$0xff] }
 0x2fc   : > { %v1202_v60 = vmul.f32 1.442695, %v1201_v59  ;;  %v1499_v59 = vld [vmem:[%s2290_s8 + $0x38] sm:$0xff] }
 0x2fd   : > { %v1036_v61 = vpop.permute.xlu1 %1035 }
 0x2fe   : > { %1930 = vpow2.f32 %v1202_v60  ;;  %1786 = vmatpush3.msra.mxu1 %v1036_v61  ;;  %v1885_v60 = vpack.c.bf16 %v1499_v59, %v1498_v58  ;;  %v1500_v61 = vld [vmem:[%s2290_s8 + $0x40] sm:$0xff] }
 0x2ff   : > { %1788 = vmatmul.mubr.msk.f32.vlgmr.msra.gmra.mrb[8].mxu1 %vm607_vm2, %v1929_v55  ;;  %1795 = vmatprep.subr.mxu1 %v1954_v6  ;;  %v1496_v55 = vld [vmem:[%s2290_s8 + $0x20] sm:$0xff] }
 0x300   : > { %1796 = vmatpush3.msra.mxu1 %v1209_v62  ;;  %1797 = vmatprep.mubr.msk.f32.mxu1 %vm1953_vm0, %v1954_v6  ;;  %v1882_v57 = vpack.c.bf16 %v1497_v56, %v1496_v55  ;;  %v1501_v62 = vld [vmem:[%s2290_s8 + $0x48] sm:$0xff] }
 0x301   : > { %1863 = vmatprep.subr.bf16.mxu1 %v1952_v3 }
 0x302   : > { %1883 = vmatpush3.bf16.msra.mxu0 %v1882_v57 }
 0x303   : > { %1884 = vmatprep.subr.bf16.mxu0 %v1952_v3 }
 0x306   : > { %1886 = vmatpush3.bf16.msra.mxu0 %v1885_v60 }
 0x307   : > { %1887 = vmatprep.subr.bf16.mxu0 %v1952_v3 }
 0x308   : > { %v1931_v63 = vpop.eup %1930 }
 0x309   : > { %1798 = vmatmul.mubr.msk.f32.vlgmr.msra.gmra.mrb[10].mxu1 %vm607_vm2, %v1931_v63  ;;  %v1204_v0 = vsel %vm607_vm2, %v1931_v63, 0.0  ;;  %v1888_v63 = vpack.c.bf16 %v1501_v62, %v1500_v61 }
 0x30a   : > { %1205 = vadd.xlane.f32.xlu0 %v1204_v0  ;;  %1808 = vmatprep.mubr.msk.f32.mxu1 %vm1953_vm0, %v1954_v6  ;;  %v1502_v0 = vld [vmem:[%s2290_s8 + $0x50] sm:$0xff] }
 0x30b   : > { %1865 = vmatpush3.bf16.msra.mxu1 %v1864_v20  ;;  %1889 = vmatpush3.bf16.msra.mxu0 %v1888_v63  ;;  %v1694_v20 = vld [vmem:[%s2289_s7] ss:$0 sm:$0xff] }
 0x30c   : > { %1866 = vmatprep.subr.bf16.mxu1 %v1952_v3  ;;  %1890 = vmatprep.subr.bf16.mxu0 %v1952_v3 }
 0x30f   : > { %1868 = vmatpush3.bf16.msra.mxu1 %v1867_v25  ;;  %v1696_v25 = vld [vmem:[%s2291_s9] ss:$0 sm:$0xff] }
 0x310   : > { %1869 = vmatprep.subr.bf16.mxu1 %v1952_v3 }
 0x366   : > { %v860_v1 = vpop.xlane.xlu1 %859 }
 0x36a   : > { %v692_v2 = vpop.xlane.xlu1 %691  ;;  %v1033_v14 = vpop.xlane.xlu0 %1032 }
 0x36b   : > { %1932 = vrcp.f32 %v692_v2 }
 0x36c   : > { %1934 = vrcp.f32 %v860_v1  ;;  %v1503_v1 = vld [vmem:[%s2290_s8 + $0x58] sm:$0xff] }
 0x36d   : > { %1936 = vrcp.f32 %v1033_v14  ;;  %v1891_v2 = vpack.c.bf16 %v1503_v1, %v1502_v0 }
 0x36f   : > { %1892 = vmatpush3.bf16.msra.mxu0 %v1891_v2 }
 0x370   : > { %1893 = vmatprep.subr.bf16.mxu0 %v1952_v3 }
 0x375   : > { %v1933_v4 = vpop.eup %1932 }
 0x376   : > { %v1935_v10 = vpop.eup %1934 }
 0x377   : > { %v1937_v18 = vpop.eup %1936 }
 0x397   : > { %v1206_v15 = vpop.xlane.xlu0 %1205 }
 0x398   : > { %1938 = vrcp.f32 %v1206_v15  ;;  %v1693_v15 = vld [vmem:[%s2293_s11] ss:$0 sm:$0xff] }
 0x3a2   : > { %v1939_v26 = vpop.eup %1938 }
 0x3a7   : > { %v766_v5 = vpop.f32.mrb[4].mxu1 }
 0x3a8   : > { %v770_v7 = vmul.f32 %v1933_v4, %v766_v5  ;;  %v1769_v9 = vpop.f32.mrb[5].mxu1  ;;  %v1504_v4 = vld [vmem:[%s2290_s8 + $0x60] sm:$0xff]  ;;  %v1505_v5 = vld [vmem:[%s2290_s8 + $0x68] sm:$0xff] }
 0x3aa   : > { %771 = vst.msk [vmem:[#allocation2] sm:$0xff] %vm607_vm2, %v770_v7  ;;  %v1894_v7 = vpack.c.bf16 %v1505_v5, %v1504_v4 }
 0x3ab   : > { %v934_v11 = vpop.f32.mrb[6].mxu1 }
 0x3ac   : > { %v938_v12 = vmul.f32 %v1935_v10, %v934_v11  ;;  %v1779_v13 = vpop.f32.mrb[7].mxu1  ;;  %1895 = vmatpush3.bf16.msra.mxu0 %v1894_v7 }
 0x3ad   : > { %1896 = vmatprep.subr.bf16.mxu0 %v1952_v3  ;;  %v1692_v13 = vld [vmem:[%s2292_s10] ss:$0 sm:$0xff] }
 0x3ae   : > { %940 = vrot.lane.b32.xlu0 %v938_v12, %s1966_s20 }
 0x3d2   : > { %v1107_v19 = vpop.f32.mrb[8].mxu1 }
 0x3d3   : > { %v1111_v23 = vmul.f32 %v1937_v18, %v1107_v19  ;;  %v1789_v24 = vpop.f32.mrb[9].mxu1  ;;  %v1507_v18 = vld [vmem:[%s2290_s8 + $0x78] sm:$0xff] }
 0x3d5   : > { %1113 = vrot.lane.b32.xlu1 %v1111_v23, %s1967_s30 }
 0x3dc   : > { %v1280_v27 = vpop.f32.mrb[10].mxu1 }
 0x3dd   : > { %v1284_v28 = vmul.f32 %v1939_v26, %v1280_v27  ;;  %v1799_v29 = vpop.f32.mrb[11].mxu1 }
 0x3df   : > { %1286 = vrot.lane.b32.xlu1 %v1284_v28, %s1968_s0 }
 0x420   : > { %v941_v30 = vpop.permute.xlu0 %940 }
 0x421   : > { %944 = vst.msk [vmem:[#allocation2] sm:$0xff] %vm943_vm3, %v941_v30 }
 0x447   : > { %v1114_v31 = vpop.permute.xlu1 %1113 }
 0x448   : > { %1117 = vst.msk [vmem:[#allocation2] sm:$0xff] %vm1116_vm4, %v1114_v31 }
 0x451   : > { %v1287_v32 = vpop.permute.xlu1 %1286 }
 0x452   : > { %1290 = vst.msk [vmem:[#allocation2] sm:$0xff] %vm1289_vm5, %v1287_v32 }
 0x459   : > { %v1291_v33 = vld [vmem:[#allocation2] sm:$0xff] }
 0x45a   : > { %1809 = vmatmul.mubr.msk.f32.vlgmr.msra.gmra.mrb[12].mxu1 %vm529_vm1, %v1291_v33 }
 0x45b   : > { %1819 = vmatprep.mubr.msk.f32.mxu1 %vm1953_vm0, %v1954_v6  ;;  %v1407_v6 = vld [vmem:[%s2288_s6] sm:$0xff] }
 0x45c   : > { %v1870_v46 = vpack.c.bf16 %v1408_v45, %v1407_v6 }
 0x45e   : > { %1871 = vmatpush3.bf16.msra.mxu1 %v1870_v46 }
 0x45f   : > { %1872 = vmatprep.subr.bf16.mxu1 %v1952_v3  ;;  %v1506_v3 = vld [vmem:[%s2290_s8 + $0x70] sm:$0xff] }
 0x460   : > { %v1897_v19 = vpack.c.bf16 %v1507_v18, %v1506_v3 }
 0x462   : > { %1898 = vmatpush3.bf16.msra.mxu0 %v1897_v19 }
 0x52d   : > { %v1372_v35 = vpop.f32.mrb[12].mxu1 }
 0x52e   : > { %v1373_v36 = vadd.f32 %v1690_v34, %v1372_v35  ;;  %v1810_v37 = vpop.f32.mrb[13].mxu1 }
 0x530   : > { %v1376_v38 = vadd.f32 %v1373_v36, %v2089_v8  ;;  %v1409_v8 = vld [vmem:[%s2288_s6 + $0x10] sm:$0xff] }
 0x531   : > { %v1873_v48 = vpack.c.bf16 %v1410_v47, %v1409_v8 }
 0x532   : > { %v1379_v39 = vsel %vm529_vm1, %v1376_v38, 0.0 }
 0x533   : > { %1380 = vadd.xlane.f32.xlu0 %v1379_v39  ;;  %1874 = vmatpush3.bf16.msra.mxu1 %v1873_v48 }
 0x5c0   : > { %v1381_v40 = vpop.xlane.xlu0 %1380 }
 0x5c1   : > { %v1383_v41 = vmul.f32 0.03125, %v1381_v40  ;;  %v1697_v40 = vld [vmem:[%s2294_s12] ss:$0 sm:$0xff] }
 0x5c3   : > { %v1384_v42 = vsub.f32 %v1376_v38, %v1383_v41 }
 0x5c5   : > { %v1385_v43 = vmul.f32 %v1384_v42, %v1384_v42 }
 0x5c7   : > { %v1386_v44 = vsel %vm529_vm1, %v1385_v43, 0.0 }
 0x5c8   : > { %1387 = vadd.xlane.f32.xlu1 %v1386_v44 }
 0x655   : > { %v1388_v9 = vpop.xlane.xlu1 %1387 }
 0x656   : > { %v1389_v10 = vmul.f32 0.03125, %v1388_v9 }
 0x658   : > { %v1390_v11 = vadd.f32 1e-05, %v1389_v10 }
 0x65a   : > { %1940 = vrsqrt.f32 %v1390_v11 }
 0x664   : > { %v1941_v12 = vpop.eup %1940 }
 0x665   : > { %v1392_v14 = vmul.f32 %v1941_v12, %v1384_v42  ;;  %v1698_v42 = vld [vmem:[%s2295_s13] ss:$0 sm:$0xff] }
 0x667   : > { %v1399_v16 = vmul.f32 %v1692_v13, %v1392_v14 }
 0x669   : > { %v1406_v17 = vadd.f32 %v1693_v15, %v1399_v16 }
 0x66b   : > { %1820 = vmatmul.mubr.msk.f32.vlgmr.msra.gmra.mrb[14].mxu1 %vm529_vm1, %v1406_v17 }
 0x73e   : > { %v1487_v21 = vpop.f32.mrb[14].mxu1 }
 0x73f   : > { %v1488_v22 = vadd.f32 %v1694_v20, %v1487_v21  ;;  %v1821_v23 = vpop.f32.mrb[15].mxu1 }
 0x741   : > { %v1491_v24 = vmax.f32 %v1488_v22, 0.0 }
 0x743   : > { %1855 = vmatmul.mubr.f32.vlgmr.msra.gmra.mrb[6].mxu0 %v1491_v24 }
 0x816   : > { %v1581_v26 = vpop.f32.mrb[6].mxu0 }
 0x817   : > { %v1582_v27 = vadd.f32 %v1696_v25, %v1581_v26  ;;  %v1856_v28 = vpop.f32.mrb[7].mxu0 }
 0x819   : > { %v1585_v29 = vadd.f32 %v1582_v27, %v1406_v17 }
 0x81b   : > { %v1588_v30 = vsel %vm529_vm1, %v1585_v29, 0.0 }
 0x81c   : > { %1589 = vadd.xlane.f32.xlu0 %v1588_v30 }
 0x8a9   : > { %v1590_v31 = vpop.xlane.xlu0 %1589 }
 0x8aa   : > { %v1591_v32 = vmul.f32 0.03125, %v1590_v31 }
 0x8ac   : > { %v1592_v33 = vsub.f32 %v1585_v29, %v1591_v32 }
 0x8ae   : > { %v1593_v34 = vmul.f32 %v1592_v33, %v1592_v33 }
 0x8b0   : > { %v1594_v35 = vsel %vm529_vm1, %v1593_v34, 0.0 }
 0x8b1   : > { %1595 = vadd.xlane.f32.xlu0 %v1594_v35 }
 0x93e   : > { %v1596_v36 = vpop.xlane.xlu0 %1595 }
 0x93f   : > { %v1597_v37 = vmul.f32 0.03125, %v1596_v36 }
 0x941   : > { %v1598_v38 = vadd.f32 1e-05, %v1597_v37 }
 0x943   : > { %1942 = vrsqrt.f32 %v1598_v38 }
 0x94d   : > { %v1943_v39 = vpop.eup %1942 }
 0x94e   : > { %v1600_v41 = vmul.f32 %v1943_v39, %v1592_v33 }
 0x950   : > { %v1607_v43 = vmul.f32 %v1697_v40, %v1600_v41 }
 0x952   : > { %v1614_v44 = vadd.f32 %v1698_v42, %v1607_v43 }
 0x954   : > { %1615 = vst.msk [vmem:[%s516_s17] sm:$0xff] %vm529_vm1, %v1614_v44 }
 0x955 PF: > { %s26_s21 = sadd.s32 1, %s1950_s21  }
 0x956   : > { %p23_p4 = scmp.ge.s32.totalorder %s26_s21, 4  }
 0x958   :  { %25 = sbr.rel (!%p23_p4) target bundleno = 2 (0x2), region = 114 }

</bundles_post_ra>
